<compile_context>
chip_gen: v7x
topology: tpu7x:2x2x1
jax: 0.10.0
libtpu: 0.0.40
codegen_flags: <defaults>
</compile_context>

<pallas_src>
import functools
import math

import jax
import jax.numpy as jnp
from jax.experimental import pallas as pl
from jax.experimental.pallas import tpu as pltpu


# ---------------------------------------------------------------------------
# Packed parameter layout (per layer).
# ---------------------------------------------------------------------------
# 11 (K, K) weight matrices, stored bf16, stacked as wkk[layer, idx, K, K]:
W_KEY_L, W_QUERY_L, W_VALUE_L = 0, 1, 2            # DecoderBlock key/query/value_linear
W_MA_Q, W_MA_K, W_MA_V, W_MA_O = 3, 4, 5, 6        # masked self-attention Q/K/V/O
W_CA_Q, W_CA_K, W_CA_V, W_CA_O = 7, 8, 9, 10       # cross attention Q/K/V/O
NUM_W_KK = 11

# 18 K-sized vectors (biases / LayerNorm), stored f32, vecs[layer, idx, K]:
V_B_KEY_L, V_B_QUERY_L, V_B_VALUE_L = 0, 1, 2
V_MA_BQ, V_MA_BK, V_MA_BV, V_MA_BO = 3, 4, 5, 6
V_CA_BQ, V_CA_BK, V_CA_BV, V_CA_BO = 7, 8, 9, 10
V_FC_B2 = 11
V_G1, V_BE1, V_G2, V_BE2, V_G3, V_BE3 = 12, 13, 14, 15, 16, 17
NUM_VEC = 18

NEG_INF = -1e30


# ---------------------------------------------------------------------------
# Fused decoder kernel: one (batch chunk, layer) step per grid point.
# ---------------------------------------------------------------------------
def decoder_kernel(x_ref, ek_ref, ev_ref, wkk_ref, fc_w1_ref, fc_w2_ref,
                   vecs_ref, fc_b1_ref, out_ref, mask_ref, *,
                   heads, kv_tile, ffn_chunk):
    layer = pl.program_id(1)
    bc, seq_len, emb = out_ref.shape
    hd = emb // heads
    tokens = bc * seq_len
    nk = fc_w1_ref.shape[-1]
    scale = 1.0 / math.sqrt(hd)

    # Layer 0 of this chunk: seed the resident carry and build the additive
    # causal mask once (instead of rebuilding iotas every layer step).
    @pl.when(layer == 0)
    def _():
        out_ref[...] = x_ref[...]
        row = jax.lax.broadcasted_iota(jnp.int32, (seq_len, seq_len), 0)
        col = jax.lax.broadcasted_iota(jnp.int32, (seq_len, seq_len), 1)
        mask_ref[...] = jnp.where(row >= col, 0.0, NEG_INF).astype(jnp.float32)

    # f32 running activation; bf16 view is cast exactly once per layer step.
    x = out_ref[...].reshape(tokens, emb)
    x_bf = x.astype(jnp.bfloat16)
    ek_bf = ek_ref[...].reshape(tokens, emb)        # already bf16
    ev_bf = ev_ref[...].reshape(tokens, emb)        # already bf16

    def vrow(i):                                    # (1, K) broadcastable row
        return vecs_ref[0, i:i + 1, :]

    def mm(a_bf, w_bf):                             # bf16 MXU, f32 accumulate
        return jnp.dot(a_bf, w_bf, preferred_element_type=jnp.float32)

    def layer_norm(v, g_idx, b_idx, eps=1e-5):
        mean = jnp.mean(v, axis=-1, keepdims=True)
        var = jnp.mean((v - mean) ** 2, axis=-1, keepdims=True)
        return (v - mean) * jax.lax.rsqrt(var + eps) * vrow(g_idx) + vrow(b_idx)

    def heads_fold(t_f32):
        """(tokens, K) f32 -> (heads*bc, S, hd) bf16, heads-major order."""
        parts = [t_f32[:, h * hd:(h + 1) * hd] for h in range(heads)]
        t3 = jnp.stack(parts, axis=0).astype(jnp.bfloat16)   # (H, tokens, hd)
        return t3.reshape(heads * bc, seq_len, hd)

    def mha(keys_bf, queries_bf, values_bf, w_base, b_base, masked):
        """Packed multi-head attention; args follow (keys, queries, values)."""
        q = mm(queries_bf, wkk_ref[0, w_base + 0]) + vrow(b_base + 0)
        k = mm(keys_bf, wkk_ref[0, w_base + 1]) + vrow(b_base + 1)
        v = mm(values_bf, wkk_ref[0, w_base + 2]) + vrow(b_base + 2)
        q3, k3, v3 = heads_fold(q), heads_fold(k), heads_fold(v)

        nb = heads * bc
        m_i = jnp.full((nb, seq_len, 1), -jnp.inf, jnp.float32)
        l_i = jnp.zeros((nb, seq_len, 1), jnp.float32)
        acc = jnp.zeros((nb, seq_len, hd), jnp.float32)
        # Online-softmax over KV tiles: live state bounded by (nb, S, kv_tile).
        # TODO(synk): also tile the query axis and skip fully-masked causal
        # tiles for very long sequences; one KV tile at these sizes.
        for t in range(seq_len // kv_tile):
            lo = t * kv_tile
            k_t = k3[:, lo:lo + kv_tile, :]
            v_t = v3[:, lo:lo + kv_tile, :]
            s = jnp.einsum("bqd,bkd->bqk", q3, k_t,
                           preferred_element_type=jnp.float32) * scale
            if masked:
                s = s + mask_ref[:, lo:lo + kv_tile][None, :, :]
            m_new = jnp.maximum(m_i, jnp.max(s, axis=-1, keepdims=True))
            alpha = jnp.exp(m_i - m_new)
            p = jnp.exp(s - m_new)
            l_i = alpha * l_i + jnp.sum(p, axis=-1, keepdims=True)
            acc = alpha * acc + jnp.einsum(
                "bqk,bkd->bqd", p.astype(jnp.bfloat16), v_t,
                preferred_element_type=jnp.float32)
            m_i = m_new
        attn = acc * pl.reciprocal(l_i, approx=True)          # (nb, S, hd)

        # Output projection with head-major W_O (H, hd, K): batched matmul +
        # head-sum instead of a heads->lanes concat transpose.
        wo = jnp.stack([wkk_ref[0, w_base + 3, h * hd:(h + 1) * hd, :]
                        for h in range(heads)], axis=0)       # (H, hd, K) bf16
        attn_h = attn.astype(jnp.bfloat16).reshape(heads, tokens, hd)
        proj = jnp.einsum("hqd,hdk->hqk", attn_h, wo,
                          preferred_element_type=jnp.float32)  # (H, tokens, K)
        return jnp.sum(proj, axis=0) + vrow(b_base + 3)        # (tokens, K)

    # ---- DecoderBlock.forward ---------------------------------------------
    keys = mm(x_bf, wkk_ref[0, W_KEY_L]) + vrow(V_B_KEY_L)
    queries = mm(x_bf, wkk_ref[0, W_QUERY_L]) + vrow(V_B_QUERY_L)
    vals = mm(x_bf, wkk_ref[0, W_VALUE_L]) + vrow(V_B_VALUE_L)

    res = mha(keys.astype(jnp.bfloat16), queries.astype(jnp.bfloat16),
              vals.astype(jnp.bfloat16), W_MA_Q, V_MA_BQ, masked=True)
    x = layer_norm(x + res, V_G1, V_BE1)
    x_bf = x.astype(jnp.bfloat16)

    # Cross attention, reference call order attention(x, enc_key, enc_val, None)
    # i.e. keys=x, queries=enc_key, values=enc_val.
    res = mha(x_bf, ek_bf, ev_bf, W_CA_Q, V_CA_BQ, masked=False)
    x = layer_norm(res + x, V_G2, V_BE2)
    x_bf = x.astype(jnp.bfloat16)

    # Feed-forward, chunked over the hidden (N*K) dimension.
    acc = jnp.zeros((tokens, emb), jnp.float32)
    for c in range(nk // ffn_chunk):
        lo = c * ffn_chunk
        h_c = jnp.maximum(
            mm(x_bf, fc_w1_ref[0, :, lo:lo + ffn_chunk])
            + fc_b1_ref[0, :, lo:lo + ffn_chunk], 0.0)
        acc = acc + mm(h_c.astype(jnp.bfloat16),
                       fc_w2_ref[0, lo:lo + ffn_chunk, :])
    res = acc + vrow(V_FC_B2)
    x = layer_norm(res + x, V_G3, V_BE3)

    out_ref[...] = x.reshape(bc, seq_len, emb)


def decoder_blocks_pallas(x, enc_key, enc_val, params, heads):
    b, s, k = x.shape
    assert k % heads == 0, "embedding size must be divisible by heads"
    wkk, fc_w1, fc_w2 = params["wkk"], params["fc_w1"], params["fc_w2"]
    vecs, fc_b1 = params["vecs"], params["fc_b1"]
    layers = wkk.shape[0]
    nk = fc_w1.shape[-1]

    # Per-core batch chunking: a leading "parallel" axis of size <= 2 lets the
    # two TensorCores of a v7x chip split the batch, while weights are fetched
    # at most twice per layer (instead of once per batch element).
    n_chunks = 2 if (b >= 2 and b % 2 == 0) else 1
    bc = b // n_chunks

    # Tiling knobs (degenerate to a single tile at small shapes).
    kv_tile = s if s <= 256 else (256 if s % 256 == 0 else s)
    ffn_chunk = nk if nk <= 512 else (512 if nk % 512 == 0 else nk)

    # enc_key / enc_val are only ever consumed as bf16 matmul operands:
    # ship them in bf16 (half the HBM traffic).  The carry stays f32.
    ek = enc_key.astype(jnp.bfloat16)
    ev = enc_val.astype(jnp.bfloat16)

    act_spec = pl.BlockSpec((bc, s, k), lambda ci, li: (ci, 0, 0))
    in_specs = [
        act_spec,                                                    # x (f32 seed)
        act_spec,                                                    # enc_key bf16
        act_spec,                                                    # enc_val bf16
        pl.BlockSpec((1, NUM_W_KK, k, k), lambda ci, li: (li, 0, 0, 0)),
        pl.BlockSpec((1, k, nk), lambda ci, li: (li, 0, 0)),         # fc_w1
        pl.BlockSpec((1, nk, k), lambda ci, li: (li, 0, 0)),         # fc_w2
        pl.BlockSpec((1, NUM_VEC, k), lambda ci, li: (li, 0, 0)),    # packed vecs
        pl.BlockSpec((1, 1, nk), lambda ci, li: (li, 0, 0)),         # fc_b1
    ]
    out_spec = pl.BlockSpec((bc, s, k), lambda ci, li: (ci, 0, 0))

    # Per-generation VMEM budget instead of a hard-coded limit.
    try:
        vmem_cap = pltpu.get_tpu_info().vmem_capacity_bytes
    except Exception:
        vmem_cap = 64 * 1024 * 1024
    vmem_limit = max(32 * 1024 * 1024,
                     min(int(vmem_cap * 0.8), 100 * 1024 * 1024))

    kernel = functools.partial(decoder_kernel, heads=heads,
                               kv_tile=kv_tile, ffn_chunk=ffn_chunk)
    return pl.pallas_call(
        kernel,
        out_shape=jax.ShapeDtypeStruct((b, s, k), jnp.float32),
        grid=(n_chunks, layers),
        in_specs=in_specs,
        out_specs=out_spec,
        scratch_shapes=[pltpu.VMEM((s, s), jnp.float32)],  # additive causal mask
        compiler_params=pltpu.CompilerParams(
            # chunk axis independent (v7x: one chunk per TensorCore); layer
            # axis carries the resident activation -> sequential.
            dimension_semantics=("parallel", "arbitrary"),
            vmem_limit_bytes=vmem_limit,
        ),
    )(x, ek, ev, wkk, fc_w1, fc_w2, vecs, fc_b1)


# ---------------------------------------------------------------------------
# Parameter initialization (deterministic, synthetic).
# ---------------------------------------------------------------------------
def init_decoder_params(key, n, k, vocab_size, seq_length, layers):
    k_emb, k_pos, k_wkk, k_w1, k_w2, k_vec, k_b1 = jax.random.split(key, 7)
    wkk = (0.02 * jax.random.normal(k_wkk, (layers, NUM_W_KK, k, k),
                                    jnp.float32)).astype(jnp.bfloat16)
    fc_w1 = (0.02 * jax.random.normal(k_w1, (layers, k, n * k),
                                      jnp.float32)).astype(jnp.bfloat16)
    fc_w2 = (0.02 * jax.random.normal(k_w2, (layers, n * k, k),
                                      jnp.float32)).astype(jnp.bfloat16)
    vecs = 0.02 * jax.random.normal(k_vec, (layers, NUM_VEC, k), jnp.float32)
    vecs = vecs.at[:, jnp.array([V_G1, V_G2, V_G3]), :].add(1.0)  # gammas ~ 1
    fc_b1 = 0.02 * jax.random.normal(k_b1, (layers, 1, n * k), jnp.float32)
    return {
        "seq_embed": 0.02 * jax.random.normal(k_emb, (vocab_size, k), jnp.float32),
        "pos_embed": 0.02 * jax.random.normal(k_pos, (seq_length, k), jnp.float32),
        "wkk": wkk, "fc_w1": fc_w1, "fc_w2": fc_w2,
        "vecs": vecs, "fc_b1": fc_b1,
    }


def decoder_forward(tokens, enc_key, enc_val, params, heads):
    # Embedding lookups (gather) are glue in plain JAX; all decoder blocks run
    # inside the single fused Pallas kernel.
    seq = jnp.take(params["seq_embed"], tokens, axis=0)       # (B, S, K)
    x = seq + params["pos_embed"][None, :, :]                 # + (1, S, K)
    return decoder_blocks_pallas(x, enc_key, enc_val, params, heads)


# ---------------------------------------------------------------------------
# Pure-JAX reference (mirrors the kernel's bf16-matmul numerics).
# ---------------------------------------------------------------------------
def reference_forward(tokens, enc_key, enc_val, params, heads):
    def mm(a, b):   # emulate bf16 operands + f32 accumulate
        return jnp.dot(a.astype(jnp.bfloat16).astype(jnp.float32),
                       b.astype(jnp.bfloat16).astype(jnp.float32))

    def ln(v, g, b):
        mu = jnp.mean(v, -1, keepdims=True)
        var = jnp.mean((v - mu) ** 2, -1, keepdims=True)
        return (v - mu) / jnp.sqrt(var + 1e-5) * g + b

    seq = jnp.take(params["seq_embed"], tokens, axis=0)
    x_all = seq + params["pos_embed"][None]
    bsz, s, k = x_all.shape
    hd = k // heads
    scale = 1.0 / math.sqrt(hd)
    causal = jnp.tril(jnp.ones((s, s), bool))
    n_layers = params["wkk"].shape[0]

    def mha(key_in, q_in, v_in, w, vec, wb, bb, mask):
        q = mm(q_in, w[wb + 0]) + vec[bb + 0]
        kx = mm(key_in, w[wb + 1]) + vec[bb + 1]
        vx = mm(v_in, w[wb + 2]) + vec[bb + 2]
        outs = []
        for h in range(heads):
            lo, hi = h * hd, (h + 1) * hd
            sc = mm(q[:, lo:hi], kx[:, lo:hi].T) * scale
            if mask is not None:
                sc = jnp.where(mask, sc, -1e30)
            sc = sc - sc.max(-1, keepdims=True)
            p = jnp.exp(sc)
            p = p / p.sum(-1, keepdims=True)
            outs.append(mm(p, vx[:, lo:hi]))
        o = jnp.concatenate(outs, axis=-1)
        return mm(o, w[wb + 3]) + vec[bb + 3]

    results = []
    for bi in range(bsz):
        x, ek, ev = x_all[bi], enc_key[bi], enc_val[bi]
        for li in range(n_layers):
            w, vec = params["wkk"][li], params["vecs"][li]
            keys = mm(x, w[W_KEY_L]) + vec[V_B_KEY_L]
            queries = mm(x, w[W_QUERY_L]) + vec[V_B_QUERY_L]
            vals = mm(x, w[W_VALUE_L]) + vec[V_B_VALUE_L]
            res = mha(keys, queries, vals, w, vec, W_MA_Q, V_MA_BQ, causal)
            x = ln(x + res, vec[V_G1], vec[V_BE1])
            res = mha(x, ek, ev, w, vec, W_CA_Q, V_CA_BQ, None)
            x = ln(res + x, vec[V_G2], vec[V_BE2])
            hid = jnp.maximum(mm(x, params["fc_w1"][li]) + params["fc_b1"][li], 0.0)
            res = mm(hid, params["fc_w2"][li]) + vec[V_FC_B2]
            x = ln(res + x, vec[V_G3], vec[V_BE3])
        results.append(x)
    return jnp.stack(results, axis=0)


if __name__ == "__main__":
    # Small shapes consistent with the module.
    B, K, HEADS, N, VOCAB, SEQ, LAYERS = 2, 32, 4, 4, 50, 8, 2

    root = jax.random.PRNGKey(0)
    k_tok, k_ek, k_ev, k_par = jax.random.split(root, 4)

    tokens = jax.random.randint(k_tok, (B, SEQ), 0, VOCAB, dtype=jnp.int32)
    enc_key = jax.random.normal(k_ek, (B, SEQ, K), jnp.float32)
    enc_val = jax.random.normal(k_ev, (B, SEQ, K), jnp.float32)

    params = init_decoder_params(k_par, N, K, VOCAB, SEQ, LAYERS)

    out = decoder_forward(tokens, enc_key, enc_val, params, HEADS)
    out = jax.block_until_ready(out)

    assert out.shape == (B, SEQ, K), out.shape
    assert bool(jnp.all(jnp.isfinite(out)))

    ref = reference_forward(tokens, enc_key, enc_val, params, HEADS)
    max_err = float(jnp.max(jnp.abs(out - ref)))
    assert max_err < 2e-2, f"kernel/reference mismatch: max abs err {max_err}"

    print("KERNEL_OK")
</pallas_src>

<mosaic_0001>
module attributes {stable_mosaic.version = 11 : i64} {
  func.func @decoder_kernel(%arg0: i32, %arg1: i32, %arg2: memref<1x8x32xf32, #tpu.memory_space<vmem>>, %arg3: memref<1x8x32xbf16, #tpu.memory_space<vmem>>, %arg4: memref<1x8x32xbf16, #tpu.memory_space<vmem>>, %arg5: memref<1x11x32x32xbf16, #tpu.memory_space<vmem>>, %arg6: memref<1x32x128xbf16, #tpu.memory_space<vmem>>, %arg7: memref<1x128x32xbf16, #tpu.memory_space<vmem>>, %arg8: memref<1x18x32xf32, #tpu.memory_space<vmem>>, %arg9: memref<1x1x128xf32, #tpu.memory_space<vmem>>, %arg10: memref<1x8x32xf32, #tpu.memory_space<vmem>>, %arg11: memref<8x8xf32, #tpu.memory_space<vmem>>) attributes {dimension_semantics = [#tpu.dimension_semantics<parallel>, #tpu.dimension_semantics<arbitrary>], iteration_bounds = array<i64: 2, 2>, scalar_prefetch = 0 : i64, scratch_operands = 1 : i64, tpu.core_type = #tpu.core_type<tc>, window_params = [{transform_indices = @transform_0, window_bounds = array<i64: 1, 8, 32>}, {transform_indices = @transform_1, window_bounds = array<i64: 1, 8, 32>}, {transform_indices = @transform_2, window_bounds = array<i64: 1, 8, 32>}, {transform_indices = @transform_3, window_bounds = array<i64: 1, 11, 32, 32>}, {transform_indices = @transform_4, window_bounds = array<i64: 1, 32, 128>}, {transform_indices = @transform_5, window_bounds = array<i64: 1, 128, 32>}, {transform_indices = @transform_6, window_bounds = array<i64: 1, 18, 32>}, {transform_indices = @transform_7, window_bounds = array<i64: 1, 1, 128>}, {transform_indices = @transform_8, window_bounds = array<i64: 1, 8, 32>}]} {
    %c0_i32 = arith.constant 0 : i32
    %0 = arith.cmpi eq, %arg1, %c0_i32 : i32
    %1 = arith.extui %0 : i1 to i32
    %c0_i32_0 = arith.constant 0 : i32
    %2 = arith.cmpi ne, %1, %c0_i32_0 : i32
    scf.if %2 {
      %c0_174 = arith.constant 0 : index
      %c0_175 = arith.constant 0 : index
      %c0_176 = arith.constant 0 : index
      %336 = vector.load %arg2[%c0_174, %c0_175, %c0_176] : memref<1x8x32xf32, #tpu.memory_space<vmem>>, vector<1x8x32xf32>
      %c0_177 = arith.constant 0 : index
      %c0_178 = arith.constant 0 : index
      %c0_179 = arith.constant 0 : index
      %337 = vector.load %arg10[%c0_177, %c0_178, %c0_179] : memref<1x8x32xf32, #tpu.memory_space<vmem>>, vector<1x8x32xf32>
      tpu.vector_store %arg10[%c0_177, %c0_178, %c0_179], %336 {strides = array<i32>} : memref<1x8x32xf32, #tpu.memory_space<vmem>>, vector<1x8x32xf32>,
      %338 = tpu.iota {dimensions = array<i32: 0>} : vector<8x8xi32>
      %339 = tpu.iota {dimensions = array<i32: 1>} : vector<8x8xi32>
      %340 = arith.cmpi sge, %338, %339 : vector<8x8xi32>
      %cst_180 = arith.constant 0.000000e+00 : f32
      %cst_181 = arith.constant -1.000000e+30 : f32
      %341 = vector.broadcast %cst_180 : f32 to vector<8x8xf32>
      %342 = vector.broadcast %cst_181 : f32 to vector<8x8xf32>
      %343 = arith.select %340, %341, %342 : vector<8x8xi1>, vector<8x8xf32>
      %c0_182 = arith.constant 0 : index
      %c0_183 = arith.constant 0 : index
      %344 = vector.load %arg11[%c0_182, %c0_183] : memref<8x8xf32, #tpu.memory_space<vmem>>, vector<8x8xf32>
      tpu.vector_store %arg11[%c0_182, %c0_183], %343 {strides = array<i32>} : memref<8x8xf32, #tpu.memory_space<vmem>>, vector<8x8xf32>,
    } else {
    }
    %c0 = arith.constant 0 : index
    %c0_1 = arith.constant 0 : index
    %c0_2 = arith.constant 0 : index
    %3 = vector.load %arg10[%c0, %c0_1, %c0_2] : memref<1x8x32xf32, #tpu.memory_space<vmem>>, vector<1x8x32xf32>
    %4 = vector.shape_cast %3 : vector<1x8x32xf32> to vector<8x32xf32>
    %5 = arith.truncf %4 : vector<8x32xf32> to vector<8x32xbf16>
    %c0_3 = arith.constant 0 : index
    %c0_4 = arith.constant 0 : index
    %c0_5 = arith.constant 0 : index
    %6 = vector.load %arg3[%c0_3, %c0_4, %c0_5] : memref<1x8x32xbf16, #tpu.memory_space<vmem>>, vector<1x8x32xbf16>
    %7 = vector.shape_cast %6 : vector<1x8x32xbf16> to vector<8x32xbf16>
    %c0_6 = arith.constant 0 : index
    %c0_7 = arith.constant 0 : index
    %c0_8 = arith.constant 0 : index
    %8 = vector.load %arg4[%c0_6, %c0_7, %c0_8] : memref<1x8x32xbf16, #tpu.memory_space<vmem>>, vector<1x8x32xbf16>
    %9 = vector.shape_cast %8 : vector<1x8x32xbf16> to vector<8x32xbf16>
    %c0_9 = arith.constant 0 : index
    %c0_10 = arith.constant 0 : index
    %c0_11 = arith.constant 0 : index
    %c0_12 = arith.constant 0 : index
    %10 = vector.load %arg5[%c0_9, %c0_10, %c0_11, %c0_12] : memref<1x11x32x32xbf16, #tpu.memory_space<vmem>>, vector<1x1x32x32xbf16>
    %11 = vector.shape_cast %10 : vector<1x1x32x32xbf16> to vector<32x32xbf16>
    %cst = arith.constant dense<0.000000e+00> : vector<8x32xf32>
    %12 = tpu.matmul %5, %11, %cst {dimension_numbers = #tpu.dot_dimension_numbers<[1], [0], [0], [1], [0, 0, 1, 1], [], []>} : vector<8x32xbf16>, vector<32x32xbf16>, vector<8x32xf32> -> vector<8x32xf32>
    %c0_13 = arith.constant 0 : index
    %c0_14 = arith.constant 0 : index
    %c0_15 = arith.constant 0 : index
    %13 = vector.load %arg8[%c0_13, %c0_14, %c0_15] : memref<1x18x32xf32, #tpu.memory_space<vmem>>, vector<1x1x32xf32>
    %14 = vector.shape_cast %13 : vector<1x1x32xf32> to vector<1x32xf32>
    %15 = vector.broadcast %14 : vector<1x32xf32> to vector<8x32xf32>
    %16 = arith.addf %12, %15 : vector<8x32xf32>
    %c0_16 = arith.constant 0 : index
    %c1 = arith.constant 1 : index
    %c0_17 = arith.constant 0 : index
    %c0_18 = arith.constant 0 : index
    %17 = vector.load %arg5[%c0_16, %c1, %c0_17, %c0_18] : memref<1x11x32x32xbf16, #tpu.memory_space<vmem>>, vector<1x1x32x32xbf16>
    %18 = vector.shape_cast %17 : vector<1x1x32x32xbf16> to vector<32x32xbf16>
    %cst_19 = arith.constant dense<0.000000e+00> : vector<8x32xf32>
    %19 = tpu.matmul %5, %18, %cst_19 {dimension_numbers = #tpu.dot_dimension_numbers<[1], [0], [0], [1], [0, 0, 1, 1], [], []>} : vector<8x32xbf16>, vector<32x32xbf16>, vector<8x32xf32> -> vector<8x32xf32>
    %c0_20 = arith.constant 0 : index
    %c1_21 = arith.constant 1 : index
    %c0_22 = arith.constant 0 : index
    %20 = vector.load %arg8[%c0_20, %c1_21, %c0_22] : memref<1x18x32xf32, #tpu.memory_space<vmem>>, vector<1x1x32xf32>
    %21 = vector.shape_cast %20 : vector<1x1x32xf32> to vector<1x32xf32>
    %22 = vector.broadcast %21 : vector<1x32xf32> to vector<8x32xf32>
    %23 = arith.addf %19, %22 : vector<8x32xf32>
    %c0_23 = arith.constant 0 : index
    %c2 = arith.constant 2 : index
    %c0_24 = arith.constant 0 : index
    %c0_25 = arith.constant 0 : index
    %24 = vector.load %arg5[%c0_23, %c2, %c0_24, %c0_25] : memref<1x11x32x32xbf16, #tpu.memory_space<vmem>>, vector<1x1x32x32xbf16>
    %25 = vector.shape_cast %24 : vector<1x1x32x32xbf16> to vector<32x32xbf16>
    %cst_26 = arith.constant dense<0.000000e+00> : vector<8x32xf32>
    %26 = tpu.matmul %5, %25, %cst_26 {dimension_numbers = #tpu.dot_dimension_numbers<[1], [0], [0], [1], [0, 0, 1, 1], [], []>} : vector<8x32xbf16>, vector<32x32xbf16>, vector<8x32xf32> -> vector<8x32xf32>
    %c0_27 = arith.constant 0 : index
    %c2_28 = arith.constant 2 : index
    %c0_29 = arith.constant 0 : index
    %27 = vector.load %arg8[%c0_27, %c2_28, %c0_29] : memref<1x18x32xf32, #tpu.memory_space<vmem>>, vector<1x1x32xf32>
    %28 = vector.shape_cast %27 : vector<1x1x32xf32> to vector<1x32xf32>
    %29 = vector.broadcast %28 : vector<1x32xf32> to vector<8x32xf32>
    %30 = arith.addf %26, %29 : vector<8x32xf32>
    %31 = arith.truncf %16 : vector<8x32xf32> to vector<8x32xbf16>
    %32 = arith.truncf %23 : vector<8x32xf32> to vector<8x32xbf16>
    %33 = arith.truncf %30 : vector<8x32xf32> to vector<8x32xbf16>
    %c0_30 = arith.constant 0 : index
    %c3 = arith.constant 3 : index
    %c0_31 = arith.constant 0 : index
    %c0_32 = arith.constant 0 : index
    %34 = vector.load %arg5[%c0_30, %c3, %c0_31, %c0_32] : memref<1x11x32x32xbf16, #tpu.memory_space<vmem>>, vector<1x1x32x32xbf16>
    %35 = vector.shape_cast %34 : vector<1x1x32x32xbf16> to vector<32x32xbf16>
    %cst_33 = arith.constant dense<0.000000e+00> : vector<8x32xf32>
    %36 = tpu.matmul %32, %35, %cst_33 {dimension_numbers = #tpu.dot_dimension_numbers<[1], [0], [0], [1], [0, 0, 1, 1], [], []>} : vector<8x32xbf16>, vector<32x32xbf16>, vector<8x32xf32> -> vector<8x32xf32>
    %c0_34 = arith.constant 0 : index
    %c3_35 = arith.constant 3 : index
    %c0_36 = arith.constant 0 : index
    %37 = vector.load %arg8[%c0_34, %c3_35, %c0_36] : memref<1x18x32xf32, #tpu.memory_space<vmem>>, vector<1x1x32xf32>
    %38 = vector.shape_cast %37 : vector<1x1x32xf32> to vector<1x32xf32>
    %39 = vector.broadcast %38 : vector<1x32xf32> to vector<8x32xf32>
    %40 = arith.addf %36, %39 : vector<8x32xf32>
    %c0_37 = arith.constant 0 : index
    %c4 = arith.constant 4 : index
    %c0_38 = arith.constant 0 : index
    %c0_39 = arith.constant 0 : index
    %41 = vector.load %arg5[%c0_37, %c4, %c0_38, %c0_39] : memref<1x11x32x32xbf16, #tpu.memory_space<vmem>>, vector<1x1x32x32xbf16>
    %42 = vector.shape_cast %41 : vector<1x1x32x32xbf16> to vector<32x32xbf16>
    %cst_40 = arith.constant dense<0.000000e+00> : vector<8x32xf32>
    %43 = tpu.matmul %31, %42, %cst_40 {dimension_numbers = #tpu.dot_dimension_numbers<[1], [0], [0], [1], [0, 0, 1, 1], [], []>} : vector<8x32xbf16>, vector<32x32xbf16>, vector<8x32xf32> -> vector<8x32xf32>
    %c0_41 = arith.constant 0 : index
    %c4_42 = arith.constant 4 : index
    %c0_43 = arith.constant 0 : index
    %44 = vector.load %arg8[%c0_41, %c4_42, %c0_43] : memref<1x18x32xf32, #tpu.memory_space<vmem>>, vector<1x1x32xf32>
    %45 = vector.shape_cast %44 : vector<1x1x32xf32> to vector<1x32xf32>
    %46 = vector.broadcast %45 : vector<1x32xf32> to vector<8x32xf32>
    %47 = arith.addf %43, %46 : vector<8x32xf32>
    %c0_44 = arith.constant 0 : index
    %c5 = arith.constant 5 : index
    %c0_45 = arith.constant 0 : index
    %c0_46 = arith.constant 0 : index
    %48 = vector.load %arg5[%c0_44, %c5, %c0_45, %c0_46] : memref<1x11x32x32xbf16, #tpu.memory_space<vmem>>, vector<1x1x32x32xbf16>
    %49 = vector.shape_cast %48 : vector<1x1x32x32xbf16> to vector<32x32xbf16>
    %cst_47 = arith.constant dense<0.000000e+00> : vector<8x32xf32>
    %50 = tpu.matmul %33, %49, %cst_47 {dimension_numbers = #tpu.dot_dimension_numbers<[1], [0], [0], [1], [0, 0, 1, 1], [], []>} : vector<8x32xbf16>, vector<32x32xbf16>, vector<8x32xf32> -> vector<8x32xf32>
    %c0_48 = arith.constant 0 : index
    %c5_49 = arith.constant 5 : index
    %c0_50 = arith.constant 0 : index
    %51 = vector.load %arg8[%c0_48, %c5_49, %c0_50] : memref<1x18x32xf32, #tpu.memory_space<vmem>>, vector<1x1x32xf32>
    %52 = vector.shape_cast %51 : vector<1x1x32xf32> to vector<1x32xf32>
    %53 = vector.broadcast %52 : vector<1x32xf32> to vector<8x32xf32>
    %54 = arith.addf %50, %53 : vector<8x32xf32>
    %55 = vector.extract_strided_slice %40 {offsets = [0, 0], sizes = [8, 8], strides = [1, 1]} : vector<8x32xf32> to vector<8x8xf32>
    %56 = vector.extract_strided_slice %40 {offsets = [0, 8], sizes = [8, 8], strides = [1, 1]} : vector<8x32xf32> to vector<8x8xf32>
    %57 = vector.extract_strided_slice %40 {offsets = [0, 16], sizes = [8, 8], strides = [1, 1]} : vector<8x32xf32> to vector<8x8xf32>
    %58 = vector.extract_strided_slice %40 {offsets = [0, 24], sizes = [8, 8], strides = [1, 1]} : vector<8x32xf32> to vector<8x8xf32>
    %59 = vector.shape_cast %55 : vector<8x8xf32> to vector<1x8x8xf32>
    %60 = vector.shape_cast %56 : vector<8x8xf32> to vector<1x8x8xf32>
    %61 = vector.shape_cast %57 : vector<8x8xf32> to vector<1x8x8xf32>
    %62 = vector.shape_cast %58 : vector<8x8xf32> to vector<1x8x8xf32>
    %63 = tpu.concatenate %59, %60, %61, %62 in 0 : vector<1x8x8xf32>, vector<1x8x8xf32>, vector<1x8x8xf32>, vector<1x8x8xf32> -> vector<4x8x8xf32>
    %64 = arith.truncf %63 : vector<4x8x8xf32> to vector<4x8x8xbf16>
    %65 = vector.extract_strided_slice %47 {offsets = [0, 0], sizes = [8, 8], strides = [1, 1]} : vector<8x32xf32> to vector<8x8xf32>
    %66 = vector.extract_strided_slice %47 {offsets = [0, 8], sizes = [8, 8], strides = [1, 1]} : vector<8x32xf32> to vector<8x8xf32>
    %67 = vector.extract_strided_slice %47 {offsets = [0, 16], sizes = [8, 8], strides = [1, 1]} : vector<8x32xf32> to vector<8x8xf32>
    %68 = vector.extract_strided_slice %47 {offsets = [0, 24], sizes = [8, 8], strides = [1, 1]} : vector<8x32xf32> to vector<8x8xf32>
    %69 = vector.shape_cast %65 : vector<8x8xf32> to vector<1x8x8xf32>
    %70 = vector.shape_cast %66 : vector<8x8xf32> to vector<1x8x8xf32>
    %71 = vector.shape_cast %67 : vector<8x8xf32> to vector<1x8x8xf32>
    %72 = vector.shape_cast %68 : vector<8x8xf32> to vector<1x8x8xf32>
    %73 = tpu.concatenate %69, %70, %71, %72 in 0 : vector<1x8x8xf32>, vector<1x8x8xf32>, vector<1x8x8xf32>, vector<1x8x8xf32> -> vector<4x8x8xf32>
    %74 = arith.truncf %73 : vector<4x8x8xf32> to vector<4x8x8xbf16>
    %75 = vector.extract_strided_slice %54 {offsets = [0, 0], sizes = [8, 8], strides = [1, 1]} : vector<8x32xf32> to vector<8x8xf32>
    %76 = vector.extract_strided_slice %54 {offsets = [0, 8], sizes = [8, 8], strides = [1, 1]} : vector<8x32xf32> to vector<8x8xf32>
    %77 = vector.extract_strided_slice %54 {offsets = [0, 16], sizes = [8, 8], strides = [1, 1]} : vector<8x32xf32> to vector<8x8xf32>
    %78 = vector.extract_strided_slice %54 {offsets = [0, 24], sizes = [8, 8], strides = [1, 1]} : vector<8x32xf32> to vector<8x8xf32>
    %79 = vector.shape_cast %75 : vector<8x8xf32> to vector<1x8x8xf32>
    %80 = vector.shape_cast %76 : vector<8x8xf32> to vector<1x8x8xf32>
    %81 = vector.shape_cast %77 : vector<8x8xf32> to vector<1x8x8xf32>
    %82 = vector.shape_cast %78 : vector<8x8xf32> to vector<1x8x8xf32>
    %83 = tpu.concatenate %79, %80, %81, %82 in 0 : vector<1x8x8xf32>, vector<1x8x8xf32>, vector<1x8x8xf32>, vector<1x8x8xf32> -> vector<4x8x8xf32>
    %84 = arith.truncf %83 : vector<4x8x8xf32> to vector<4x8x8xbf16>
    %cst_51 = arith.constant 0xFF800000 : f32
    %85 = vector.broadcast %cst_51 : f32 to vector<4x8x1xf32>
    %cst_52 = arith.constant 0.000000e+00 : f32
    %86 = vector.broadcast %cst_52 : f32 to vector<4x8x1xf32>
    %cst_53 = arith.constant 0.000000e+00 : f32
    %87 = vector.broadcast %cst_53 : f32 to vector<4x8x8xf32>
    "tpu.trace_start"() <{level = 10 : i32, message = "bqd,bkd->bqk"}> : () -> ()
    %cst_54 = arith.constant dense<0.000000e+00> : vector<4x8x8xf32>
    %88 = tpu.matmul %64, %74, %cst_54 {dimension_numbers = #tpu.dot_dimension_numbers<[2], [2], [1], [1], [0, 0, 0, 1, 1, 1], [0], [0]>} : vector<4x8x8xbf16>, vector<4x8x8xbf16>, vector<4x8x8xf32> -> vector<4x8x8xf32>
    "tpu.trace_stop"() : () -> ()
    %cst_55 = arith.constant 0.353553385 : f32
    %89 = vector.broadcast %cst_55 : f32 to vector<4x8x8xf32>
    %90 = arith.mulf %88, %89 : vector<4x8x8xf32>
    %c0_56 = arith.constant 0 : index
    %c0_57 = arith.constant 0 : index
    %91 = vector.load %arg11[%c0_56, %c0_57] : memref<8x8xf32, #tpu.memory_space<vmem>>, vector<8x8xf32>
    %92 = vector.shape_cast %91 : vector<8x8xf32> to vector<1x8x8xf32>
    %93 = vector.broadcast %92 : vector<1x8x8xf32> to vector<4x8x8xf32>
    %94 = arith.addf %90, %93 : vector<4x8x8xf32>
    %cst_58 = arith.constant dense<0xFF800000> : vector<4x8xf32>
    %95 = vector.multi_reduction <maximumf>, %94, %cst_58 [2] : vector<4x8x8xf32> to vector<4x8xf32>
    %96 = vector.shape_cast %95 : vector<4x8xf32> to vector<4x8x1xf32>
    %97 = arith.maximumf %85, %96 : vector<4x8x1xf32>
    %98 = arith.subf %85, %97 : vector<4x8x1xf32>
    %99 = math.exp %98 : vector<4x8x1xf32>
    %100 = vector.broadcast %97 : vector<4x8x1xf32> to vector<4x8x8xf32>
    %101 = arith.subf %94, %100 : vector<4x8x8xf32>
    %102 = math.exp %101 : vector<4x8x8xf32>
    %103 = arith.mulf %99, %86 : vector<4x8x1xf32>
    %cst_59 = arith.constant dense<0.000000e+00> : vector<4x8xf32>
    %104 = vector.multi_reduction <add>, %102, %cst_59 [2] : vector<4x8x8xf32> to vector<4x8xf32>
    %105 = vector.shape_cast %104 : vector<4x8xf32> to vector<4x8x1xf32>
    %106 = arith.addf %103, %105 : vector<4x8x1xf32>
    %107 = vector.broadcast %99 : vector<4x8x1xf32> to vector<4x8x8xf32>
    %108 = arith.mulf %107, %87 : vector<4x8x8xf32>
    %109 = arith.truncf %102 : vector<4x8x8xf32> to vector<4x8x8xbf16>
    "tpu.trace_start"() <{level = 10 : i32, message = "bqk,bkd->bqd"}> : () -> ()
    %cst_60 = arith.constant dense<0.000000e+00> : vector<4x8x8xf32>
    %110 = tpu.matmul %109, %84, %cst_60 {dimension_numbers = #tpu.dot_dimension_numbers<[2], [1], [1], [2], [0, 0, 0, 1, 1, 2], [0], [0]>} : vector<4x8x8xbf16>, vector<4x8x8xbf16>, vector<4x8x8xf32> -> vector<4x8x8xf32>
    "tpu.trace_stop"() : () -> ()
    %111 = arith.addf %108, %110 : vector<4x8x8xf32>
    %112 = tpu.reciprocal %106 {approx = true} : vector<4x8x1xf32> -> vector<4x8x1xf32>
    %113 = vector.broadcast %112 : vector<4x8x1xf32> to vector<4x8x8xf32>
    %114 = arith.mulf %111, %113 : vector<4x8x8xf32>
    %c0_61 = arith.constant 0 : index
    %c6 = arith.constant 6 : index
    %c0_62 = arith.constant 0 : index
    %c0_63 = arith.constant 0 : index
    %115 = vector.load %arg5[%c0_61, %c6, %c0_62, %c0_63] : memref<1x11x32x32xbf16, #tpu.memory_space<vmem>>, vector<1x1x8x32xbf16>
    %116 = vector.shape_cast %115 : vector<1x1x8x32xbf16> to vector<8x32xbf16>
    %c0_64 = arith.constant 0 : index
    %c6_65 = arith.constant 6 : index
    %c8 = arith.constant 8 : index
    %c0_66 = arith.constant 0 : index
    %117 = vector.load %arg5[%c0_64, %c6_65, %c8, %c0_66] : memref<1x11x32x32xbf16, #tpu.memory_space<vmem>>, vector<1x1x8x32xbf16>
    %118 = vector.shape_cast %117 : vector<1x1x8x32xbf16> to vector<8x32xbf16>
    %c0_67 = arith.constant 0 : index
    %c6_68 = arith.constant 6 : index
    %c16 = arith.constant 16 : index
    %c0_69 = arith.constant 0 : index
    %119 = vector.load %arg5[%c0_67, %c6_68, %c16, %c0_69] : memref<1x11x32x32xbf16, #tpu.memory_space<vmem>>, vector<1x1x8x32xbf16>
    %120 = vector.shape_cast %119 : vector<1x1x8x32xbf16> to vector<8x32xbf16>
    %c0_70 = arith.constant 0 : index
    %c6_71 = arith.constant 6 : index
    %c24 = arith.constant 24 : index
    %c0_72 = arith.constant 0 : index
    %121 = vector.load %arg5[%c0_70, %c6_71, %c24, %c0_72] : memref<1x11x32x32xbf16, #tpu.memory_space<vmem>>, vector<1x1x8x32xbf16>
    %122 = vector.shape_cast %121 : vector<1x1x8x32xbf16> to vector<8x32xbf16>
    %123 = vector.shape_cast %116 : vector<8x32xbf16> to vector<1x8x32xbf16>
    %124 = vector.shape_cast %118 : vector<8x32xbf16> to vector<1x8x32xbf16>
    %125 = vector.shape_cast %120 : vector<8x32xbf16> to vector<1x8x32xbf16>
    %126 = vector.shape_cast %122 : vector<8x32xbf16> to vector<1x8x32xbf16>
    %127 = tpu.concatenate %123, %124, %125, %126 in 0 : vector<1x8x32xbf16>, vector<1x8x32xbf16>, vector<1x8x32xbf16>, vector<1x8x32xbf16> -> vector<4x8x32xbf16>
    %128 = arith.truncf %114 : vector<4x8x8xf32> to vector<4x8x8xbf16>
    "tpu.trace_start"() <{level = 10 : i32, message = "hqd,hdk->hqk"}> : () -> ()
    %cst_73 = arith.constant dense<0.000000e+00> : vector<4x8x32xf32>
    %129 = tpu.matmul %128, %127, %cst_73 {dimension_numbers = #tpu.dot_dimension_numbers<[2], [1], [1], [2], [0, 0, 0, 1, 1, 2], [0], [0]>} : vector<4x8x8xbf16>, vector<4x8x32xbf16>, vector<4x8x32xf32> -> vector<4x8x32xf32>
    "tpu.trace_stop"() : () -> ()
    %cst_74 = arith.constant dense<0.000000e+00> : vector<8x32xf32>
    %130 = vector.multi_reduction <add>, %129, %cst_74 [0] : vector<4x8x32xf32> to vector<8x32xf32>
    %c0_75 = arith.constant 0 : index
    %c6_76 = arith.constant 6 : index
    %c0_77 = arith.constant 0 : index
    %131 = vector.load %arg8[%c0_75, %c6_76, %c0_77] : memref<1x18x32xf32, #tpu.memory_space<vmem>>, vector<1x1x32xf32>
    %132 = vector.shape_cast %131 : vector<1x1x32xf32> to vector<1x32xf32>
    %133 = vector.broadcast %132 : vector<1x32xf32> to vector<8x32xf32>
    %134 = arith.addf %130, %133 : vector<8x32xf32>
    %135 = arith.addf %4, %134 : vector<8x32xf32>
    %cst_78 = arith.constant dense<0.000000e+00> : vector<8xf32>
    %136 = vector.multi_reduction <add>, %135, %cst_78 [1] : vector<8x32xf32> to vector<8xf32>
    %137 = vector.shape_cast %136 : vector<8xf32> to vector<8x1xf32>
    %cst_79 = arith.constant 3.200000e+01 : f32
    %138 = vector.broadcast %cst_79 : f32 to vector<8x1xf32>
    %139 = arith.divf %137, %138 : vector<8x1xf32>
    %140 = vector.broadcast %139 : vector<8x1xf32> to vector<8x32xf32>
    %141 = arith.subf %135, %140 : vector<8x32xf32>
    %142 = arith.mulf %141, %141 : vector<8x32xf32>
    %cst_80 = arith.constant dense<0.000000e+00> : vector<8xf32>
    %143 = vector.multi_reduction <add>, %142, %cst_80 [1] : vector<8x32xf32> to vector<8xf32>
    %144 = vector.shape_cast %143 : vector<8xf32> to vector<8x1xf32>
    %cst_81 = arith.constant 3.200000e+01 : f32
    %145 = vector.broadcast %cst_81 : f32 to vector<8x1xf32>
    %146 = arith.divf %144, %145 : vector<8x1xf32>
    %147 = vector.broadcast %139 : vector<8x1xf32> to vector<8x32xf32>
    %148 = arith.subf %135, %147 : vector<8x32xf32>
    %cst_82 = arith.constant 9.99999974E-6 : f32
    %149 = vector.broadcast %cst_82 : f32 to vector<8x1xf32>
    %150 = arith.addf %146, %149 : vector<8x1xf32>
    %151 = math.rsqrt %150 : vector<8x1xf32>
    %152 = vector.broadcast %151 : vector<8x1xf32> to vector<8x32xf32>
    %153 = arith.mulf %148, %152 : vector<8x32xf32>
    %c0_83 = arith.constant 0 : index
    %c12 = arith.constant 12 : index
    %c0_84 = arith.constant 0 : index
    %154 = vector.load %arg8[%c0_83, %c12, %c0_84] : memref<1x18x32xf32, #tpu.memory_space<vmem>>, vector<1x1x32xf32>
    %155 = vector.shape_cast %154 : vector<1x1x32xf32> to vector<1x32xf32>
    %156 = vector.broadcast %155 : vector<1x32xf32> to vector<8x32xf32>
    %157 = arith.mulf %153, %156 : vector<8x32xf32>
    %c0_85 = arith.constant 0 : index
    %c13 = arith.constant 13 : index
    %c0_86 = arith.constant 0 : index
    %158 = vector.load %arg8[%c0_85, %c13, %c0_86] : memref<1x18x32xf32, #tpu.memory_space<vmem>>, vector<1x1x32xf32>
    %159 = vector.shape_cast %158 : vector<1x1x32xf32> to vector<1x32xf32>
    %160 = vector.broadcast %159 : vector<1x32xf32> to vector<8x32xf32>
    %161 = arith.addf %157, %160 : vector<8x32xf32>
    %162 = arith.truncf %161 : vector<8x32xf32> to vector<8x32xbf16>
    %c0_87 = arith.constant 0 : index
    %c7 = arith.constant 7 : index
    %c0_88 = arith.constant 0 : index
    %c0_89 = arith.constant 0 : index
    %163 = vector.load %arg5[%c0_87, %c7, %c0_88, %c0_89] : memref<1x11x32x32xbf16, #tpu.memory_space<vmem>>, vector<1x1x32x32xbf16>
    %164 = vector.shape_cast %163 : vector<1x1x32x32xbf16> to vector<32x32xbf16>
    %cst_90 = arith.constant dense<0.000000e+00> : vector<8x32xf32>
    %165 = tpu.matmul %7, %164, %cst_90 {dimension_numbers = #tpu.dot_dimension_numbers<[1], [0], [0], [1], [0, 0, 1, 1], [], []>} : vector<8x32xbf16>, vector<32x32xbf16>, vector<8x32xf32> -> vector<8x32xf32>
    %c0_91 = arith.constant 0 : index
    %c7_92 = arith.constant 7 : index
    %c0_93 = arith.constant 0 : index
    %166 = vector.load %arg8[%c0_91, %c7_92, %c0_93] : memref<1x18x32xf32, #tpu.memory_space<vmem>>, vector<1x1x32xf32>
    %167 = vector.shape_cast %166 : vector<1x1x32xf32> to vector<1x32xf32>
    %168 = vector.broadcast %167 : vector<1x32xf32> to vector<8x32xf32>
    %169 = arith.addf %165, %168 : vector<8x32xf32>
    %c0_94 = arith.constant 0 : index
    %c8_95 = arith.constant 8 : index
    %c0_96 = arith.constant 0 : index
    %c0_97 = arith.constant 0 : index
    %170 = vector.load %arg5[%c0_94, %c8_95, %c0_96, %c0_97] : memref<1x11x32x32xbf16, #tpu.memory_space<vmem>>, vector<1x1x32x32xbf16>
    %171 = vector.shape_cast %170 : vector<1x1x32x32xbf16> to vector<32x32xbf16>
    %cst_98 = arith.constant dense<0.000000e+00> : vector<8x32xf32>
    %172 = tpu.matmul %162, %171, %cst_98 {dimension_numbers = #tpu.dot_dimension_numbers<[1], [0], [0], [1], [0, 0, 1, 1], [], []>} : vector<8x32xbf16>, vector<32x32xbf16>, vector<8x32xf32> -> vector<8x32xf32>
    %c0_99 = arith.constant 0 : index
    %c8_100 = arith.constant 8 : index
    %c0_101 = arith.constant 0 : index
    %173 = vector.load %arg8[%c0_99, %c8_100, %c0_101] : memref<1x18x32xf32, #tpu.memory_space<vmem>>, vector<1x1x32xf32>
    %174 = vector.shape_cast %173 : vector<1x1x32xf32> to vector<1x32xf32>
    %175 = vector.broadcast %174 : vector<1x32xf32> to vector<8x32xf32>
    %176 = arith.addf %172, %175 : vector<8x32xf32>
    %c0_102 = arith.constant 0 : index
    %c9 = arith.constant 9 : index
    %c0_103 = arith.constant 0 : index
    %c0_104 = arith.constant 0 : index
    %177 = vector.load %arg5[%c0_102, %c9, %c0_103, %c0_104] : memref<1x11x32x32xbf16, #tpu.memory_space<vmem>>, vector<1x1x32x32xbf16>
    %178 = vector.shape_cast %177 : vector<1x1x32x32xbf16> to vector<32x32xbf16>
    %cst_105 = arith.constant dense<0.000000e+00> : vector<8x32xf32>
    %179 = tpu.matmul %9, %178, %cst_105 {dimension_numbers = #tpu.dot_dimension_numbers<[1], [0], [0], [1], [0, 0, 1, 1], [], []>} : vector<8x32xbf16>, vector<32x32xbf16>, vector<8x32xf32> -> vector<8x32xf32>
    %c0_106 = arith.constant 0 : index
    %c9_107 = arith.constant 9 : index
    %c0_108 = arith.constant 0 : index
    %180 = vector.load %arg8[%c0_106, %c9_107, %c0_108] : memref<1x18x32xf32, #tpu.memory_space<vmem>>, vector<1x1x32xf32>
    %181 = vector.shape_cast %180 : vector<1x1x32xf32> to vector<1x32xf32>
    %182 = vector.broadcast %181 : vector<1x32xf32> to vector<8x32xf32>
    %183 = arith.addf %179, %182 : vector<8x32xf32>
    %184 = vector.extract_strided_slice %169 {offsets = [0, 0], sizes = [8, 8], strides = [1, 1]} : vector<8x32xf32> to vector<8x8xf32>
    %185 = vector.extract_strided_slice %169 {offsets = [0, 8], sizes = [8, 8], strides = [1, 1]} : vector<8x32xf32> to vector<8x8xf32>
    %186 = vector.extract_strided_slice %169 {offsets = [0, 16], sizes = [8, 8], strides = [1, 1]} : vector<8x32xf32> to vector<8x8xf32>
    %187 = vector.extract_strided_slice %169 {offsets = [0, 24], sizes = [8, 8], strides = [1, 1]} : vector<8x32xf32> to vector<8x8xf32>
    %188 = vector.shape_cast %184 : vector<8x8xf32> to vector<1x8x8xf32>
    %189 = vector.shape_cast %185 : vector<8x8xf32> to vector<1x8x8xf32>
    %190 = vector.shape_cast %186 : vector<8x8xf32> to vector<1x8x8xf32>
    %191 = vector.shape_cast %187 : vector<8x8xf32> to vector<1x8x8xf32>
    %192 = tpu.concatenate %188, %189, %190, %191 in 0 : vector<1x8x8xf32>, vector<1x8x8xf32>, vector<1x8x8xf32>, vector<1x8x8xf32> -> vector<4x8x8xf32>
    %193 = arith.truncf %192 : vector<4x8x8xf32> to vector<4x8x8xbf16>
    %194 = vector.extract_strided_slice %176 {offsets = [0, 0], sizes = [8, 8], strides = [1, 1]} : vector<8x32xf32> to vector<8x8xf32>
    %195 = vector.extract_strided_slice %176 {offsets = [0, 8], sizes = [8, 8], strides = [1, 1]} : vector<8x32xf32> to vector<8x8xf32>
    %196 = vector.extract_strided_slice %176 {offsets = [0, 16], sizes = [8, 8], strides = [1, 1]} : vector<8x32xf32> to vector<8x8xf32>
    %197 = vector.extract_strided_slice %176 {offsets = [0, 24], sizes = [8, 8], strides = [1, 1]} : vector<8x32xf32> to vector<8x8xf32>
    %198 = vector.shape_cast %194 : vector<8x8xf32> to vector<1x8x8xf32>
    %199 = vector.shape_cast %195 : vector<8x8xf32> to vector<1x8x8xf32>
    %200 = vector.shape_cast %196 : vector<8x8xf32> to vector<1x8x8xf32>
    %201 = vector.shape_cast %197 : vector<8x8xf32> to vector<1x8x8xf32>
    %202 = tpu.concatenate %198, %199, %200, %201 in 0 : vector<1x8x8xf32>, vector<1x8x8xf32>, vector<1x8x8xf32>, vector<1x8x8xf32> -> vector<4x8x8xf32>
    %203 = arith.truncf %202 : vector<4x8x8xf32> to vector<4x8x8xbf16>
    %204 = vector.extract_strided_slice %183 {offsets = [0, 0], sizes = [8, 8], strides = [1, 1]} : vector<8x32xf32> to vector<8x8xf32>
    %205 = vector.extract_strided_slice %183 {offsets = [0, 8], sizes = [8, 8], strides = [1, 1]} : vector<8x32xf32> to vector<8x8xf32>
    %206 = vector.extract_strided_slice %183 {offsets = [0, 16], sizes = [8, 8], strides = [1, 1]} : vector<8x32xf32> to vector<8x8xf32>
    %207 = vector.extract_strided_slice %183 {offsets = [0, 24], sizes = [8, 8], strides = [1, 1]} : vector<8x32xf32> to vector<8x8xf32>
    %208 = vector.shape_cast %204 : vector<8x8xf32> to vector<1x8x8xf32>
    %209 = vector.shape_cast %205 : vector<8x8xf32> to vector<1x8x8xf32>
    %210 = vector.shape_cast %206 : vector<8x8xf32> to vector<1x8x8xf32>
    %211 = vector.shape_cast %207 : vector<8x8xf32> to vector<1x8x8xf32>
    %212 = tpu.concatenate %208, %209, %210, %211 in 0 : vector<1x8x8xf32>, vector<1x8x8xf32>, vector<1x8x8xf32>, vector<1x8x8xf32> -> vector<4x8x8xf32>
    %213 = arith.truncf %212 : vector<4x8x8xf32> to vector<4x8x8xbf16>
    %cst_109 = arith.constant 0xFF800000 : f32
    %214 = vector.broadcast %cst_109 : f32 to vector<4x8x1xf32>
    %cst_110 = arith.constant 0.000000e+00 : f32
    %215 = vector.broadcast %cst_110 : f32 to vector<4x8x1xf32>
    %cst_111 = arith.constant 0.000000e+00 : f32
    %216 = vector.broadcast %cst_111 : f32 to vector<4x8x8xf32>
    "tpu.trace_start"() <{level = 10 : i32, message = "bqd,bkd->bqk"}> : () -> ()
    %cst_112 = arith.constant dense<0.000000e+00> : vector<4x8x8xf32>
    %217 = tpu.matmul %193, %203, %cst_112 {dimension_numbers = #tpu.dot_dimension_numbers<[2], [2], [1], [1], [0, 0, 0, 1, 1, 1], [0], [0]>} : vector<4x8x8xbf16>, vector<4x8x8xbf16>, vector<4x8x8xf32> -> vector<4x8x8xf32>
    "tpu.trace_stop"() : () -> ()
    %cst_113 = arith.constant 0.353553385 : f32
    %218 = vector.broadcast %cst_113 : f32 to vector<4x8x8xf32>
    %219 = arith.mulf %217, %218 : vector<4x8x8xf32>
    %cst_114 = arith.constant dense<0xFF800000> : vector<4x8xf32>
    %220 = vector.multi_reduction <maximumf>, %219, %cst_114 [2] : vector<4x8x8xf32> to vector<4x8xf32>
    %221 = vector.shape_cast %220 : vector<4x8xf32> to vector<4x8x1xf32>
    %222 = arith.maximumf %214, %221 : vector<4x8x1xf32>
    %223 = arith.subf %214, %222 : vector<4x8x1xf32>
    %224 = math.exp %223 : vector<4x8x1xf32>
    %225 = vector.broadcast %222 : vector<4x8x1xf32> to vector<4x8x8xf32>
    %226 = arith.subf %219, %225 : vector<4x8x8xf32>
    %227 = math.exp %226 : vector<4x8x8xf32>
    %228 = arith.mulf %224, %215 : vector<4x8x1xf32>
    %cst_115 = arith.constant dense<0.000000e+00> : vector<4x8xf32>
    %229 = vector.multi_reduction <add>, %227, %cst_115 [2] : vector<4x8x8xf32> to vector<4x8xf32>
    %230 = vector.shape_cast %229 : vector<4x8xf32> to vector<4x8x1xf32>
    %231 = arith.addf %228, %230 : vector<4x8x1xf32>
    %232 = vector.broadcast %224 : vector<4x8x1xf32> to vector<4x8x8xf32>
    %233 = arith.mulf %232, %216 : vector<4x8x8xf32>
    %234 = arith.truncf %227 : vector<4x8x8xf32> to vector<4x8x8xbf16>
    "tpu.trace_start"() <{level = 10 : i32, message = "bqk,bkd->bqd"}> : () -> ()
    %cst_116 = arith.constant dense<0.000000e+00> : vector<4x8x8xf32>
    %235 = tpu.matmul %234, %213, %cst_116 {dimension_numbers = #tpu.dot_dimension_numbers<[2], [1], [1], [2], [0, 0, 0, 1, 1, 2], [0], [0]>} : vector<4x8x8xbf16>, vector<4x8x8xbf16>, vector<4x8x8xf32> -> vector<4x8x8xf32>
    "tpu.trace_stop"() : () -> ()
    %236 = arith.addf %233, %235 : vector<4x8x8xf32>
    %237 = tpu.reciprocal %231 {approx = true} : vector<4x8x1xf32> -> vector<4x8x1xf32>
    %238 = vector.broadcast %237 : vector<4x8x1xf32> to vector<4x8x8xf32>
    %239 = arith.mulf %236, %238 : vector<4x8x8xf32>
    %c0_117 = arith.constant 0 : index
    %c10 = arith.constant 10 : index
    %c0_118 = arith.constant 0 : index
    %c0_119 = arith.constant 0 : index
    %240 = vector.load %arg5[%c0_117, %c10, %c0_118, %c0_119] : memref<1x11x32x32xbf16, #tpu.memory_space<vmem>>, vector<1x1x8x32xbf16>
    %241 = vector.shape_cast %240 : vector<1x1x8x32xbf16> to vector<8x32xbf16>
    %c0_120 = arith.constant 0 : index
    %c10_121 = arith.constant 10 : index
    %c8_122 = arith.constant 8 : index
    %c0_123 = arith.constant 0 : index
    %242 = vector.load %arg5[%c0_120, %c10_121, %c8_122, %c0_123] : memref<1x11x32x32xbf16, #tpu.memory_space<vmem>>, vector<1x1x8x32xbf16>
    %243 = vector.shape_cast %242 : vector<1x1x8x32xbf16> to vector<8x32xbf16>
    %c0_124 = arith.constant 0 : index
    %c10_125 = arith.constant 10 : index
    %c16_126 = arith.constant 16 : index
    %c0_127 = arith.constant 0 : index
    %244 = vector.load %arg5[%c0_124, %c10_125, %c16_126, %c0_127] : memref<1x11x32x32xbf16, #tpu.memory_space<vmem>>, vector<1x1x8x32xbf16>
    %245 = vector.shape_cast %244 : vector<1x1x8x32xbf16> to vector<8x32xbf16>
    %c0_128 = arith.constant 0 : index
    %c10_129 = arith.constant 10 : index
    %c24_130 = arith.constant 24 : index
    %c0_131 = arith.constant 0 : index
    %246 = vector.load %arg5[%c0_128, %c10_129, %c24_130, %c0_131] : memref<1x11x32x32xbf16, #tpu.memory_space<vmem>>, vector<1x1x8x32xbf16>
    %247 = vector.shape_cast %246 : vector<1x1x8x32xbf16> to vector<8x32xbf16>
    %248 = vector.shape_cast %241 : vector<8x32xbf16> to vector<1x8x32xbf16>
    %249 = vector.shape_cast %243 : vector<8x32xbf16> to vector<1x8x32xbf16>
    %250 = vector.shape_cast %245 : vector<8x32xbf16> to vector<1x8x32xbf16>
    %251 = vector.shape_cast %247 : vector<8x32xbf16> to vector<1x8x32xbf16>
    %252 = tpu.concatenate %248, %249, %250, %251 in 0 : vector<1x8x32xbf16>, vector<1x8x32xbf16>, vector<1x8x32xbf16>, vector<1x8x32xbf16> -> vector<4x8x32xbf16>
    %253 = arith.truncf %239 : vector<4x8x8xf32> to vector<4x8x8xbf16>
    "tpu.trace_start"() <{level = 10 : i32, message = "hqd,hdk->hqk"}> : () -> ()
    %cst_132 = arith.constant dense<0.000000e+00> : vector<4x8x32xf32>
    %254 = tpu.matmul %253, %252, %cst_132 {dimension_numbers = #tpu.dot_dimension_numbers<[2], [1], [1], [2], [0, 0, 0, 1, 1, 2], [0], [0]>} : vector<4x8x8xbf16>, vector<4x8x32xbf16>, vector<4x8x32xf32> -> vector<4x8x32xf32>
    "tpu.trace_stop"() : () -> ()
    %cst_133 = arith.constant dense<0.000000e+00> : vector<8x32xf32>
    %255 = vector.multi_reduction <add>, %254, %cst_133 [0] : vector<4x8x32xf32> to vector<8x32xf32>
    %c0_134 = arith.constant 0 : index
    %c10_135 = arith.constant 10 : index
    %c0_136 = arith.constant 0 : index
    %256 = vector.load %arg8[%c0_134, %c10_135, %c0_136] : memref<1x18x32xf32, #tpu.memory_space<vmem>>, vector<1x1x32xf32>
    %257 = vector.shape_cast %256 : vector<1x1x32xf32> to vector<1x32xf32>
    %258 = vector.broadcast %257 : vector<1x32xf32> to vector<8x32xf32>
    %259 = arith.addf %255, %258 : vector<8x32xf32>
    %260 = arith.addf %259, %161 : vector<8x32xf32>
    %cst_137 = arith.constant dense<0.000000e+00> : vector<8xf32>
    %261 = vector.multi_reduction <add>, %260, %cst_137 [1] : vector<8x32xf32> to vector<8xf32>
    %262 = vector.shape_cast %261 : vector<8xf32> to vector<8x1xf32>
    %cst_138 = arith.constant 3.200000e+01 : f32
    %263 = vector.broadcast %cst_138 : f32 to vector<8x1xf32>
    %264 = arith.divf %262, %263 : vector<8x1xf32>
    %265 = vector.broadcast %264 : vector<8x1xf32> to vector<8x32xf32>
    %266 = arith.subf %260, %265 : vector<8x32xf32>
    %267 = arith.mulf %266, %266 : vector<8x32xf32>
    %cst_139 = arith.constant dense<0.000000e+00> : vector<8xf32>
    %268 = vector.multi_reduction <add>, %267, %cst_139 [1] : vector<8x32xf32> to vector<8xf32>
    %269 = vector.shape_cast %268 : vector<8xf32> to vector<8x1xf32>
    %cst_140 = arith.constant 3.200000e+01 : f32
    %270 = vector.broadcast %cst_140 : f32 to vector<8x1xf32>
    %271 = arith.divf %269, %270 : vector<8x1xf32>
    %272 = vector.broadcast %264 : vector<8x1xf32> to vector<8x32xf32>
    %273 = arith.subf %260, %272 : vector<8x32xf32>
    %cst_141 = arith.constant 9.99999974E-6 : f32
    %274 = vector.broadcast %cst_141 : f32 to vector<8x1xf32>
    %275 = arith.addf %271, %274 : vector<8x1xf32>
    %276 = math.rsqrt %275 : vector<8x1xf32>
    %277 = vector.broadcast %276 : vector<8x1xf32> to vector<8x32xf32>
    %278 = arith.mulf %273, %277 : vector<8x32xf32>
    %c0_142 = arith.constant 0 : index
    %c14 = arith.constant 14 : index
    %c0_143 = arith.constant 0 : index
    %279 = vector.load %arg8[%c0_142, %c14, %c0_143] : memref<1x18x32xf32, #tpu.memory_space<vmem>>, vector<1x1x32xf32>
    %280 = vector.shape_cast %279 : vector<1x1x32xf32> to vector<1x32xf32>
    %281 = vector.broadcast %280 : vector<1x32xf32> to vector<8x32xf32>
    %282 = arith.mulf %278, %281 : vector<8x32xf32>
    %c0_144 = arith.constant 0 : index
    %c15 = arith.constant 15 : index
    %c0_145 = arith.constant 0 : index
    %283 = vector.load %arg8[%c0_144, %c15, %c0_145] : memref<1x18x32xf32, #tpu.memory_space<vmem>>, vector<1x1x32xf32>
    %284 = vector.shape_cast %283 : vector<1x1x32xf32> to vector<1x32xf32>
    %285 = vector.broadcast %284 : vector<1x32xf32> to vector<8x32xf32>
    %286 = arith.addf %282, %285 : vector<8x32xf32>
    %287 = arith.truncf %286 : vector<8x32xf32> to vector<8x32xbf16>
    %cst_146 = arith.constant 0.000000e+00 : f32
    %288 = vector.broadcast %cst_146 : f32 to vector<8x32xf32>
    %c0_147 = arith.constant 0 : index
    %c0_148 = arith.constant 0 : index
    %c0_149 = arith.constant 0 : index
    %289 = vector.load %arg6[%c0_147, %c0_148, %c0_149] : memref<1x32x128xbf16, #tpu.memory_space<vmem>>, vector<1x32x128xbf16>
    %290 = vector.shape_cast %289 : vector<1x32x128xbf16> to vector<32x128xbf16>
    %cst_150 = arith.constant dense<0.000000e+00> : vector<8x128xf32>
    %291 = tpu.matmul %287, %290, %cst_150 {dimension_numbers = #tpu.dot_dimension_numbers<[1], [0], [0], [1], [0, 0, 1, 1], [], []>} : vector<8x32xbf16>, vector<32x128xbf16>, vector<8x128xf32> -> vector<8x128xf32>
    %c0_151 = arith.constant 0 : index
    %c0_152 = arith.constant 0 : index
    %c0_153 = arith.constant 0 : index
    %292 = vector.load %arg9[%c0_151, %c0_152, %c0_153] : memref<1x1x128xf32, #tpu.memory_space<vmem>>, vector<1x1x128xf32>
    %293 = vector.shape_cast %292 : vector<1x1x128xf32> to vector<1x128xf32>
    %294 = vector.broadcast %293 : vector<1x128xf32> to vector<8x128xf32>
    %295 = arith.addf %291, %294 : vector<8x128xf32>
    %cst_154 = arith.constant 0.000000e+00 : f32
    %296 = vector.broadcast %cst_154 : f32 to vector<8x128xf32>
    %297 = arith.maximumf %295, %296 : vector<8x128xf32>
    %298 = arith.truncf %297 : vector<8x128xf32> to vector<8x128xbf16>
    %c0_155 = arith.constant 0 : index
    %c0_156 = arith.constant 0 : index
    %c0_157 = arith.constant 0 : index
    %299 = vector.load %arg7[%c0_155, %c0_156, %c0_157] : memref<1x128x32xbf16, #tpu.memory_space<vmem>>, vector<1x128x32xbf16>
    %300 = vector.shape_cast %299 : vector<1x128x32xbf16> to vector<128x32xbf16>
    %cst_158 = arith.constant dense<0.000000e+00> : vector<8x32xf32>
    %301 = tpu.matmul %298, %300, %cst_158 {dimension_numbers = #tpu.dot_dimension_numbers<[1], [0], [0], [1], [0, 0, 1, 1], [], []>} : vector<8x128xbf16>, vector<128x32xbf16>, vector<8x32xf32> -> vector<8x32xf32>
    %302 = arith.addf %288, %301 : vector<8x32xf32>
    %c0_159 = arith.constant 0 : index
    %c11 = arith.constant 11 : index
    %c0_160 = arith.constant 0 : index
    %303 = vector.load %arg8[%c0_159, %c11, %c0_160] : memref<1x18x32xf32, #tpu.memory_space<vmem>>, vector<1x1x32xf32>
    %304 = vector.shape_cast %303 : vector<1x1x32xf32> to vector<1x32xf32>
    %305 = vector.broadcast %304 : vector<1x32xf32> to vector<8x32xf32>
    %306 = arith.addf %302, %305 : vector<8x32xf32>
    %307 = arith.addf %306, %286 : vector<8x32xf32>
    %cst_161 = arith.constant dense<0.000000e+00> : vector<8xf32>
    %308 = vector.multi_reduction <add>, %307, %cst_161 [1] : vector<8x32xf32> to vector<8xf32>
    %309 = vector.shape_cast %308 : vector<8xf32> to vector<8x1xf32>
    %cst_162 = arith.constant 3.200000e+01 : f32
    %310 = vector.broadcast %cst_162 : f32 to vector<8x1xf32>
    %311 = arith.divf %309, %310 : vector<8x1xf32>
    %312 = vector.broadcast %311 : vector<8x1xf32> to vector<8x32xf32>
    %313 = arith.subf %307, %312 : vector<8x32xf32>
    %314 = arith.mulf %313, %313 : vector<8x32xf32>
    %cst_163 = arith.constant dense<0.000000e+00> : vector<8xf32>
    %315 = vector.multi_reduction <add>, %314, %cst_163 [1] : vector<8x32xf32> to vector<8xf32>
    %316 = vector.shape_cast %315 : vector<8xf32> to vector<8x1xf32>
    %cst_164 = arith.constant 3.200000e+01 : f32
    %317 = vector.broadcast %cst_164 : f32 to vector<8x1xf32>
    %318 = arith.divf %316, %317 : vector<8x1xf32>
    %319 = vector.broadcast %311 : vector<8x1xf32> to vector<8x32xf32>
    %320 = arith.subf %307, %319 : vector<8x32xf32>
    %cst_165 = arith.constant 9.99999974E-6 : f32
    %321 = vector.broadcast %cst_165 : f32 to vector<8x1xf32>
    %322 = arith.addf %318, %321 : vector<8x1xf32>
    %323 = math.rsqrt %322 : vector<8x1xf32>
    %324 = vector.broadcast %323 : vector<8x1xf32> to vector<8x32xf32>
    %325 = arith.mulf %320, %324 : vector<8x32xf32>
    %c0_166 = arith.constant 0 : index
    %c16_167 = arith.constant 16 : index
    %c0_168 = arith.constant 0 : index
    %326 = vector.load %arg8[%c0_166, %c16_167, %c0_168] : memref<1x18x32xf32, #tpu.memory_space<vmem>>, vector<1x1x32xf32>
    %327 = vector.shape_cast %326 : vector<1x1x32xf32> to vector<1x32xf32>
    %328 = vector.broadcast %327 : vector<1x32xf32> to vector<8x32xf32>
    %329 = arith.mulf %325, %328 : vector<8x32xf32>
    %c0_169 = arith.constant 0 : index
    %c17 = arith.constant 17 : index
    %c0_170 = arith.constant 0 : index
    %330 = vector.load %arg8[%c0_169, %c17, %c0_170] : memref<1x18x32xf32, #tpu.memory_space<vmem>>, vector<1x1x32xf32>
    %331 = vector.shape_cast %330 : vector<1x1x32xf32> to vector<1x32xf32>
    %332 = vector.broadcast %331 : vector<1x32xf32> to vector<8x32xf32>
    %333 = arith.addf %329, %332 : vector<8x32xf32>
    %334 = vector.shape_cast %333 : vector<8x32xf32> to vector<1x8x32xf32>
    %c0_171 = arith.constant 0 : index
    %c0_172 = arith.constant 0 : index
    %c0_173 = arith.constant 0 : index
    %335 = vector.load %arg10[%c0_171, %c0_172, %c0_173] : memref<1x8x32xf32, #tpu.memory_space<vmem>>, vector<1x8x32xf32>
    tpu.vector_store %arg10[%c0_171, %c0_172, %c0_173], %334 {strides = array<i32>} : memref<1x8x32xf32, #tpu.memory_space<vmem>>, vector<1x8x32xf32>,
    return
  }
  func.func @transform_0(%arg0: i32, %arg1: i32) -> (i32, i32, i32) {
    %c0_i32 = arith.constant 0 : i32
    %c0_i32_0 = arith.constant 0 : i32
    %c0_i32_1 = arith.constant 0 : i32
    return %arg0, %c0_i32, %c0_i32_0 : i32, i32, i32
  }
  func.func @transform_1(%arg0: i32, %arg1: i32) -> (i32, i32, i32) {
    %c0_i32 = arith.constant 0 : i32
    %c0_i32_0 = arith.constant 0 : i32
    %c0_i32_1 = arith.constant 0 : i32
    return %arg0, %c0_i32, %c0_i32_0 : i32, i32, i32
  }
  func.func @transform_2(%arg0: i32, %arg1: i32) -> (i32, i32, i32) {
    %c0_i32 = arith.constant 0 : i32
    %c0_i32_0 = arith.constant 0 : i32
    %c0_i32_1 = arith.constant 0 : i32
    return %arg0, %c0_i32, %c0_i32_0 : i32, i32, i32
  }
  func.func @transform_3(%arg0: i32, %arg1: i32) -> (i32, i32, i32, i32) {
    %c0_i32 = arith.constant 0 : i32
    %c0_i32_0 = arith.constant 0 : i32
    %c0_i32_1 = arith.constant 0 : i32
    %c0_i32_2 = arith.constant 0 : i32
    return %arg1, %c0_i32, %c0_i32_0, %c0_i32_1 : i32, i32, i32, i32
  }
  func.func @transform_4(%arg0: i32, %arg1: i32) -> (i32, i32, i32) {
    %c0_i32 = arith.constant 0 : i32
    %c0_i32_0 = arith.constant 0 : i32
    %c0_i32_1 = arith.constant 0 : i32
    return %arg1, %c0_i32, %c0_i32_0 : i32, i32, i32
  }
  func.func @transform_5(%arg0: i32, %arg1: i32) -> (i32, i32, i32) {
    %c0_i32 = arith.constant 0 : i32
    %c0_i32_0 = arith.constant 0 : i32
    %c0_i32_1 = arith.constant 0 : i32
    return %arg1, %c0_i32, %c0_i32_0 : i32, i32, i32
  }
  func.func @transform_6(%arg0: i32, %arg1: i32) -> (i32, i32, i32) {
    %c0_i32 = arith.constant 0 : i32
    %c0_i32_0 = arith.constant 0 : i32
    %c0_i32_1 = arith.constant 0 : i32
    return %arg1, %c0_i32, %c0_i32_0 : i32, i32, i32
  }
  func.func @transform_7(%arg0: i32, %arg1: i32) -> (i32, i32, i32) {
    %c0_i32 = arith.constant 0 : i32
    %c0_i32_0 = arith.constant 0 : i32
    %c0_i32_1 = arith.constant 0 : i32
    return %arg1, %c0_i32, %c0_i32_0 : i32, i32, i32
  }
  func.func @transform_8(%arg0: i32, %arg1: i32) -> (i32, i32, i32) {
    %c0_i32 = arith.constant 0 : i32
    %c0_i32_0 = arith.constant 0 : i32
    %c0_i32_1 = arith.constant 0 : i32
    return %arg0, %c0_i32, %c0_i32_0 : i32, i32, i32
  }
}

</mosaic_0001>

<bundles_post_ra>
// kernel: tpu_custom_call.1
= control target key start
LH: loop header
LB: loop body
LE: loop exit
PB: predicated region body
PF: predicated region fallthrough
CT: control target
= control target key end

     0   :  { %s4369_s0 = inlined_call_operand.vmem [shape: f32[2,8,32], index: 0, kind: input, shape index: {}]   ;;  %s4370_s1 = inlined_call_operand.vmem [shape: bf16[2,8,32], index: 1, kind: input, shape index: {}]   ;;  %s4371_s2 = inlined_call_operand.vmem [shape: bf16[2,8,32], index: 2, kind: input, shape index: {}]   ;;  %s4372_s3 = inlined_call_operand.hbm [shape: bf16[2,11,32,32], index: 3, kind: input, shape index: {}]   ;;  %s4373_s4 = inlined_call_operand.vmem [shape: bf16[2,32,128], index: 4, kind: input, shape index: {}]   ;;  %s4374_s5 = inlined_call_operand.vmem [shape: bf16[2,128,32], index: 5, kind: input, shape index: {}]   ;;  %s4375_s6 = inlined_call_operand.vmem [shape: f32[2,18,32], index: 6, kind: input, shape index: {}]   ;;  %s4376_s7 = inlined_call_operand.vmem [shape: f32[2,1,128], index: 7, kind: input, shape index: {}]   ;;  %s4377_s8 = inlined_call_operand.hbm [shape: f32[2,8,32], index: 8, kind: output, shape index: {}]  }
   0x1   :  { %4392 = sst [smem:[#allocation21_spill]] %s4369_s0 }
   0x2   :  { %4393 = sst [smem:[#allocation22_spill]] %s4370_s1 }
   0x3   :  { %4394 = sst [smem:[#allocation23_spill]] %s4372_s3 }
   0x4   :  { %4395 = sst [smem:[#allocation24_spill]] %s4377_s8 }
   0x5   :  { %13 = vsyncpa [#allocation4], 0 }
   0x6   :  { %15 = vsyncpa [#allocation4 + $0x1], 0 }
   0x7   :  { %16 = vsyncpa [#allocation5], 0 }
   0x8   :  { %18 = vsyncpa [#allocation5 + $0x1], 0  ;;  %s3768_s27 = smov 0   ;;  %s3770_s28 = smov 0  }
   0x9   :  { %s3772_s29 = smov 0   ;;  %s3774_s30 = smov 0  }
   0xa   :  { %s3776_s9 = smov 0   ;;  %s3778_s10 = smov 0  }
   0xb   :  { %s3780_s11 = smov 0   ;;  %s3782_s12 = smov 0  }
   0xc   :  { %s3784_s13 = smov 0   ;;  %s3786_s14 = smov 0  }
   0xd   :  { %s3788_s15 = smov 0  }
   0xe LB: > { %4396 = sst [smem:[#allocation9_spill]] %s3671_s27  ;;  %s2889_s16 = sadd.s32 4294967295, %s3711_s15   ;;  %s3711_s15 = sphi %s3788_s15, %s24_s15   ;;  %s3707_s14 = sphi %s3786_s14, %s4432_s14   ;;  %s3703_s13 = sphi %s3784_s13, %s4431_s13   ;;  %s3699_s12 = sphi %s3782_s12, %s4430_s12   ;;  %s3695_s11 = sphi %s3780_s11, %s4429_s11   ;;  %s3691_s10 = sphi %s3778_s10, %s4428_s10   ;;  %s3687_s9 = sphi %s3776_s9, %s4427_s9   ;;  %s3683_s30 = sphi %s3774_s30, %s4426_s30   ;;  %s3679_s29 = sphi %s3772_s29, %s4425_s29   ;;  %s3675_s28 = sphi %s3770_s28, %s4434_s28   ;;  %s3671_s27 = sphi %s3768_s27, %s4433_s27  }
   0xf   : > { %4397 = sst [smem:[#allocation10_spill]] %s3679_s29  ;;  %s2890_s17 = sadd.s32 4294967294, %s3711_s15  }
  0x10   : > { %4398 = sst [smem:[#allocation11_spill]] %s3687_s9  ;;  %s33_s18 = sadd.s32 1, %s3703_s13 }
  0x11   : > { %4399 = sst [smem:[#allocation12_spill]] %s3691_s10  ;;  %s36_s19 = sadd.s32 1, %s3707_s14 }
  0x12   : > { %4400 = sst [smem:[#allocation13_spill]] %s3703_s13  ;;  %p34_p0 = scmp.ge.s32.totalorder %s33_s18, 2 }
  0x13   : > { %4401 = sst [smem:[#allocation14_spill]] %s3707_s14  ;;  %s121_s20 = sadd.s32 1, %s3691_s10 }
  0x14   : > { %4402 = sst [smem:[#allocation15_spill]] %s3711_s15  ;;  %p128_p1 = scmp.ne.s32.totalorder %s3691_s10, %s3687_s9 }
  0x15   : > { %p129_p2 = scmp.eq.s32.totalorder %s3711_s15, 0  ;;  %s4436_s18 = smov (%p34_p0, %s33_s18), 0 }
  0x16   : > { %4403 = sst [smem:[#allocation16_spill]] %s4436_s18  ;;  %s4438_s19 = smov (!%p34_p0, %s36_s19), %s3707_s14 }
  0x17   : > { %s118_s21 = ssub.s32 %s3703_s13, %s4436_s18  ;;  %p3834_p3 = por %p129_p2, %p128_p1 }
  0x18   : > { %p38_p4 = scmp.ge.s32.totalorder %s4438_s19, 2  ;;  %p119_p5 = scmp.eq.s32.totalorder %s118_s21, 0 }
  0x19   : > { %p134_p6 = scmp.ne.s32.totalorder %s3687_s9, %s3683_s30  ;;  %p135_p7 = scmp.eq.s32.totalorder %s2889_s16, 0 }
  0x1a   : > { %s4440_s19 = smov (%p38_p4, %s4438_s19), 0  ;;  %s251_s26 = sadd.s32 1, %s3679_s29 }
  0x1b   : > { %4405 = sst [smem:[#allocation17_spill]] %s4440_s19  ;;  %p3844_p8 = por %p135_p7, %p134_p6 }
  0x1c   : > { %s3842_s23 = scalar_select %p119_p5, %s3691_s10, %s121_s20  }
  0x1d   : > { %s248_s25 = ssub.s32 %s3707_s14, %s4440_s19  ;;  %p261_p10 = scmp.ne.s32.totalorder %s3679_s29, %s3675_s28 }
  0x1e   : > { %4406 = sst [smem:[#allocation18_spill]] %s3842_s23  ;;  %p249_p9 = scmp.eq.s32.totalorder %s248_s25, 0 }
  0x1f   : > { %p262_p11 = scmp.eq.s32.totalorder %s2889_s16, 3  ;;  %p267_p13 = scmp.ne.s32.totalorder %s3675_s28, %s3671_s27 }
  0x20   : > { %s3854_s21 = scalar_select %p249_p9, %s3679_s29, %s251_s26  }
  0x21   : > { %p3856_p12 = por %p262_p11, %p261_p10  ;;  %p268_p0 = scmp.eq.s32.totalorder %s2890_s17, 3 }
  0x22   : > { %4408 = sst [smem:[#allocation19_spill]] %s3854_s21  ;;  %p3379_p1 = scmp.lt.s32.totalorder %s3711_s15, 4 }
  0x23   : > { %s4409_s30 = scalar_select %p3856_p12, 1, 0 }
  0x24   : > { %s309_s20 = sand.u32 1, %s3691_s10   ;;  %p3864_p2 = por %p268_p0, %p267_p13 }
  0x25   : > { %s3363_s23 = smul.u32 176, %s309_s20  ;;  %p3870_p4 = pnand %p3379_p1, %p3834_p3 }
  0x26   : > { %s4410_s18 = scalar_select %p3864_p2, 1, 0 }
  0x27   : > { %s3364_s16 = smul.u32 2816, %s3703_s13  ;;  %s4413_s3 = sld [smem:[#allocation23_spill]] }
  0x28   : > { %4411 = sst [smem:[#allocation20_spill]] %s4410_s18  ;;  %s313_s17 = scalar_lea.vmem [#allocation3], %s3363_s23 }
  0x29   : > { %s320_s10 = sshll.u32 %s313_s17, 4  ;;  %s3882_s22 = scalar_lea.sflag [#allocation4], %s309_s20  ;;  %s3880_s10 = int_to_ptr.vmem [resolvable:$true] %s320_s10 }
  0x2a   : > { %p3561_p5 = pneg %p3870_p4 }
  0x2d   : > { %s3878_s14 = scalar_lea.hbm %s4413_s3, %s3364_s16  ;;  %s3564_s26 = scalar_lea.hbm %s4413_s3, 5632 }
  0x2e   : > { %s3559_s21 = scalar_lea.hbm %s3878_s14, 2816  ;;  %p3565_p9 = scmp.lt.u32.totalorder %s3878_s14, %s4413_s3 }
  0x2f   : > { %p3560_p3 = scmp.ne.s32.totalorder %s3878_s14, %s3559_s21  ;;  %p3566_p10 = scmp.lt.u32.totalorder %s3564_s26, %s3559_s21 }
  0x30   : > { %p3568_p13 = scmp.lt.u32.totalorder %s3559_s21, %s3878_s14 }
  0x31   : > { %p3562_p6 = pnand %p3561_p5, %p3560_p3  ;;  %p3567_p11 = por %p3566_p10, %p3565_p9 }
  0x33   : > { %p3563_p7 = pneg %p3562_p6  ;;  %p3569_p0 = por %p3568_p13, %p3567_p11 }
  0x35   : > { %p3570_p1 = pnand %p3569_p0, %p3563_p7 }
  0x37   : > { %3573 = shalt.err (!%p3570_p1)
}
  0x38   : > { %s3574_s23 = scalar_lea.vmem %s3880_s10, 2816  ;;  %s3713_s20 = smov [#allocation3]  }
  0x39   : > { %p3575_p3 = scmp.ne.s32.totalorder %s3880_s10, %s3574_s23  ;;  %s3579_s17 = sshll.u32 %s3713_s20, 4  ;;  %s3580_s17 = int_to_ptr.vmem [resolvable:$false] %s3579_s17 }
  0x3a   : > { %s3581_s29 = scalar_lea.vmem %s3580_s17, 5632  ;;  %p3582_p12 = scmp.lt.s32.totalorder %s3880_s10, %s3580_s17 }
  0x3b   : > { %p3577_p6 = pnand %p3575_p3, %p3561_p5  ;;  %p3583_p9 = scmp.lt.s32.totalorder %s3581_s29, %s3574_s23 }
  0x3d   : > { %p3578_p2 = pneg %p3577_p6  ;;  %p3584_p10 = por %p3583_p9, %p3582_p12 }
  0x3f   : > { %p3585_p11 = pnand %p3584_p10, %p3578_p2 }
  0x41   : > { %3588 = shalt.err (!%p3585_p11)
}
  0x42   : > { %s3714_s13 = smov 64   ;;  %s3715_s21 = smov 4  }
  0x43   : > { %3374 = dma.hbm_to_vmem [thread:$0]  (!%p3870_p4), %s3878_s14, 2816, %s3880_s10, %s3882_s22, %s3714_s13, %s3714_s13, %s3715_s21  }
  0x44   : > { %p2894_p5 = scmp.ge.s32.totalorder %s3711_s15, 1  ;;  %p358_p7 = scmp.lt.s32.totalorder %s3711_s15, 5 }
  0x46   : > { %p359_p13 = pnand %p2894_p5, %p358_p7 }
  0x47   : > { %s364_s19 = sand.u32 (!%p359_p13), 1, %s3687_s9  }
  0x48   : > { %362 = sbr.rel (%p359_p13) target bundleno = 4035 (0xfc3), region = 52  ;;  %s365_s26 = scalar_lea.sflag (!%p359_p13), [#allocation4], %s364_s19 }
  0x49   : > { %s3365_s16 = smul.u32 (!%p359_p13), 176, %s364_s19 }
  0x4b   : > { %s3913_s23 = scalar_lea.vmem (!%p359_p13), [#allocation3], %s3365_s16 }
  0x4f   : > { %3662 = dma.done.wait (%p3844_p8), %s365_s26, 2816  }
  0x50   : > { %3664 = vsyncadd (%p3844_p8), %s365_s26, 4294964480  ;;  %s4385_s10 = sand.u32 1, %s3675_s28   ;;  %p431_p12 = scmp.lt.s32.totalorder %s3699_s12, 1 }
  0x51   : > { %s2895_s14 = sshll.u32 %s4385_s10, 3  ;;  %p443_p2 = scmp.lt.s32.totalorder %s3695_s11, 1 }
  0x52   : > { %s432_s25 = scalar_select %p431_p12, %s3699_s12, 1 }
  0x53   : > { %s3926_s22 = scalar_select %p443_p2, %s3695_s11, 1 }
  0x54   : > { %s2896_s24 = sshll.u32 %s432_s25, 3  ;;  %s2897_s20 = sshll.u32 %s432_s25, 2 }
  0x55   : > { %s4414_s0 = sld [smem:[#allocation21_spill]]  ;;  %s4415_s1 = sld [smem:[#allocation22_spill]] }
  0x56   : > { %s3939_s3 = scalar_lea.vmem %s4371_s2, %s2897_s20  ;;  %s3030_s9 = sshll.u32 %s3926_s22, 4 }
  0x57   : > { %s3945_s15 = scalar_lea.vmem %s4373_s4, %s3030_s9  ;;  %s3031_s25 = sshll.u32 %s3926_s22, 6 }
  0x58   : > { %s3366_s29 = smul.u32 24, %s3926_s22  ;;  %p2904_p8 = scmp.ne.s32.totalorder %s3695_s11, 0 }
  0x59   : > { %vm467_vm0 = vcmask (!%p2904_p8), 261120   ;;  %v469_v1 = vlaneseq (!%p2904_p8)  ;;  %vm475_vm1 = vcmask (!%p2904_p8), 64512   ;;  %v3716_v4 = vmov (!%p2904_p8), -1e+30  }
  0x5a   : > { %s3961_s26 = scalar_lea.vmem %s4375_s6, %s3366_s29  ;;  %465 = sbr.rel (%p2904_p8) target bundleno = 97 (0x61), region = 60 }
  0x5b   : > { %s434_s13 = scalar_lea.vmem %s4414_s0, %s2896_s24  ;;  %s3934_s16 = scalar_lea.vmem %s4415_s1, %s2897_s20  ;;  %v470_v2 = vshrl.u32 (!%p2904_p8), %v469_v1, 7  ;;  %v472_v3 = vand.u32 (!%p2904_p8), 127, %v469_v1 }
  0x5c   : > { %s3951_s24 = scalar_lea.vmem %s4374_s5, %s3031_s25  ;;  %s460_s0 = scalar_lea.vmem %s4376_s7, %s3926_s22  ;;  %v466_v0 = vld [vmem:[%s434_s13] sm:$0xff] (!%p2904_p8) }
  0x5d   : > { %s3963_s1 = scalar_lea.vmem [#allocation6], %s2895_s14  ;;  %vm473_vm2 = vcmp.ge.s32.totalorder (!%p2904_p8), %v470_v2, %v472_v3 }
  0x5e   : > { %468 = vst.msk [vmem:[%s3963_s1] sm:$0xff] (!%p2904_p8), %vm467_vm0, %v466_v0  ;;  %v474_v5 = vsel (!%p2904_p8), %vm473_vm2, 0.0, %v3716_v4 }
  0x5f   : > { %476 = vst.msk [vmem:[#allocation2] sm:$0xff] (!%p2904_p8), %vm475_vm1, %v474_v5 }
  0x61 PF: > { %v3477_v6 = vld [vmem:[%s3913_s23] sm:$0xff]   ;;  %v3717_v7 = vmov 0.0   ;;  %v3478_v8 = vld [vmem:[%s3913_s23 + $0x8] sm:$0xff]   ;;  %vm3718_vm3 = vmmov 0   ;;  %v3479_v11 = vld [vmem:[%s3913_s23 + $0x10] sm:$0xff]   ;;  %vm502_vm4 = vcmask 261120  }
  0x62   : > { %3119 = vmatprep.subr.bf16.mxu1 %v3717_v7  ;;  %3151 = vmatprep.subr.bf16.mxu0 %v3717_v7  ;;  %v3482_v12 = vld [vmem:[%s3913_s23 + $0x40] sm:$0xff]   ;;  %v3480_v13 = vld [vmem:[%s3913_s23 + $0x18] sm:$0xff]   ;;  %v3483_v15 = vld [vmem:[%s3913_s23 + $0x28] sm:$0xff]   ;;  %vm910_vm5 = vcmask 64512   ;;  %s3719_s8 = smov 120   ;;  %s3720_s27 = smov 112  }
  0x63   : > { %3120 = vmatpush3.bf16.msra.mxu1 %v3477_v6  ;;  %3123 = vmatprep.mubr.msk.bf16.mxu1 %vm3718_vm3, %v3717_v7  ;;  %v3481_v14 = vld [vmem:[%s3913_s23 + $0x20] sm:$0xff]   ;;  %v3484_v16 = vld [vmem:[%s3913_s23 + $0x48] sm:$0xff]   ;;  %v3485_v17 = vld [vmem:[%s3913_s23 + $0x30] sm:$0xff]   ;;  %s3721_s9 = smov 104   ;;  %vm1167_vm6 = vcmask 1043456   ;;  %s4416_s14 = sld [smem:[#allocation24_spill]] }
  0x64   : > { %3121 = vmatprep.subr.bf16.mxu1 %v3717_v7  ;;  %3155 = vmatprep.mubr.msk.bf16.mxu0 %vm3718_vm3, %v3717_v7  ;;  %v3486_v18 = vld [vmem:[%s3913_s23 + $0x38] sm:$0xff]   ;;  %v3487_v31 = vld [vmem:[%s3913_s23 + $0x50] sm:$0xff]   ;;  %p4419_p0 = scmp.ne.s32.totalorder %s4409_s30, 0 }
  0x65   : > { %v3974_v9 = vld [vmem:[%s3963_s1] sm:$0xff]  ;;  %3152 = vmatpush3.bf16.msra.mxu0 %v3482_v12  ;;  %v2905_v19 = vld [vmem:[%s3961_s26] ss:$0 sm:$0xff]  ;;  %v2913_v26 = vld [vmem:[%s3961_s26 + $0x1] ss:$0 sm:$0xff] }
  0x66   : > { %v478_v10 = vpack.c.bf16 %v3974_v9, %v3974_v9  ;;  %3153 = vmatprep.subr.bf16.mxu0 %v3717_v7  ;;  %v2921_v34 = vld [vmem:[%s3961_s26 + $0x2] ss:$0 sm:$0xff]  ;;  %v2937_v42 = vld [vmem:[%s3961_s26 + $0x4] ss:$0 sm:$0xff]  ;;  %v2929_v50 = vld [vmem:[%s3961_s26 + $0x3] ss:$0 sm:$0xff] }
  0x67   : > { %3122 = vmatpush3.bf16.msra.mxu1 %v3478_v8  ;;  %v3488_v35 = vld [vmem:[%s3913_s23 + $0x58] sm:$0xff]  }
  0x68   : > { %3127 = vmatprep.subr.bf16.mxu1 %v3717_v7  ;;  %v2945_v57 = vld [vmem:[%s3961_s26 + $0x5] ss:$0 sm:$0xff] }
  0x69   : > { %3154 = vmatpush3.bf16.msra.mxu0 %v3484_v16  ;;  %s4417_s22 = smov %s4416_s14 }
  0x6a   : > { %3124 = vmatmul.mubr.msk.bf16.vlgmr.msra.gmra.mrb[0].mxu1 %vm502_vm4, %v478_v10  ;;  %3167 = vmatprep.subr.bf16.mxu0 %v3717_v7 }
  0x6b   : > { %3128 = vmatpush3.bf16.msra.mxu1 %v3479_v11  ;;  %3131 = vmatprep.mubr.msk.bf16.mxu1 %vm3718_vm3, %v3717_v7 }
  0x6c   : > { %3129 = vmatprep.subr.bf16.mxu1 %v3717_v7 }
  0x6f   : > { %3130 = vmatpush3.bf16.msra.mxu1 %v3480_v13 }
  0x70   : > { %3135 = vmatprep.subr.bf16.mxu1 %v3717_v7 }
  0x72   : > { %3132 = vmatmul.mubr.msk.bf16.vlgmr.msra.gmra.mrb[4].mxu1 %vm502_vm4, %v478_v10 }
  0x73   : > { %3136 = vmatpush3.bf16.msra.mxu1 %v3481_v14  ;;  %3139 = vmatprep.mubr.msk.bf16.mxu1 %vm3718_vm3, %v3717_v7 }
  0x74   : > { %3137 = vmatprep.subr.bf16.mxu1 %v3717_v7 }
  0x77   : > { %3138 = vmatpush3.bf16.msra.mxu1 %v3483_v15 }
  0x78   : > { %3143 = vmatprep.subr.bf16.mxu1 %v3717_v7 }
  0x7a   : > { %3140 = vmatmul.mubr.msk.bf16.vlgmr.msra.gmra.mrb[8].mxu1 %vm502_vm4, %v478_v10 }
  0x7b   : > { %3147 = vmatprep.mubr.msk.bf16.mxu1 %vm3718_vm3, %v3717_v7  ;;  %3144 = vmatpush3.bf16.msra.mxu1 %v3485_v17 }
  0x7c   : > { %3145 = vmatprep.subr.bf16.mxu1 %v3717_v7 }
  0x7f   : > { %3146 = vmatpush3.bf16.msra.mxu1 %v3486_v18 }
  0x80   : > { %3159 = vmatprep.subr.bf16.mxu1 %v3717_v7 }
 0x13d   : > { %v540_v20 = vpop.f32.mrb[0].mxu1 }
 0x13e   : > { %v541_v21 = vadd.f32 %v2905_v19, %v540_v20  ;;  %v3125_v22 = vpop.f32.mrb[1].mxu1 }
 0x13f   : > { %v543_v23 = vpop.f32.mrb[2].mxu1  ;;  %v1099_v22 = vld [vmem:[#allocation2] sm:$0xff] }
 0x140   : > { %v670_v24 = vpack.c.bf16 %v541_v21, %v541_v21  ;;  %v3126_v25 = vpop.f32.mrb[3].mxu1 }
 0x142   : > { %3156 = vmatmul.mubr.msk.bf16.vlgmr.msra.gmra.mrb[0].mxu0 %vm502_vm4, %v670_v24 }
 0x143   : > { %3169 = vmatprep.mubr.msk.bf16.mxu0 %vm3718_vm3, %v3717_v7 }
 0x145   : > { %v602_v27 = vpop.f32.mrb[4].mxu1 }
 0x146   : > { %v603_v28 = vadd.f32 %v2913_v26, %v602_v27  ;;  %v3133_v29 = vpop.f32.mrb[5].mxu1 }
 0x147   : > { %v605_v30 = vpop.f32.mrb[6].mxu1 }
 0x148   : > { %v671_v32 = vpack.c.bf16 %v603_v28, %v603_v28  ;;  %v3134_v33 = vpop.f32.mrb[7].mxu1 }
 0x14a   : > { %3148 = vmatmul.mubr.msk.bf16.vlgmr.msra.gmra.mrb[12].mxu1 %vm502_vm4, %v671_v32 }
 0x14b   : > { %3160 = vmatpush3.bf16.msra.mxu1 %v3487_v31  ;;  %3163 = vmatprep.mubr.msk.bf16.mxu1 %vm3718_vm3, %v3717_v7 }
 0x14c   : > { %3161 = vmatprep.subr.bf16.mxu1 %v3717_v7 }
 0x14d   : > { %v664_v36 = vpop.f32.mrb[8].mxu1 }
 0x14e   : > { %v665_v37 = vadd.f32 %v2921_v34, %v664_v36  ;;  %v3141_v38 = vpop.f32.mrb[9].mxu1 }
 0x14f   : > { %v667_v39 = vpop.f32.mrb[10].mxu1  ;;  %3162 = vmatpush3.bf16.msra.mxu1 %v3488_v35 }
 0x150   : > { %v672_v40 = vpack.c.bf16 %v665_v37, %v665_v37  ;;  %v3142_v41 = vpop.f32.mrb[11].mxu1  ;;  %3173 = vmatprep.subr.bf16.mxu1 %v3717_v7 }
 0x152   : > { %3164 = vmatmul.mubr.msk.bf16.vlgmr.msra.gmra.mrb[16].mxu1 %vm502_vm4, %v672_v40 }
 0x153   : > { %3175 = vmatprep.mubr.msk.bf16.mxu1 %vm3718_vm3, %v3717_v7 }
 0x215   : > { %v797_v43 = vpop.f32.mrb[0].mxu0 }
 0x216   : > { %v798_v44 = vadd.f32 %v2937_v42, %v797_v43  ;;  %v3157_v45 = vpop.f32.mrb[1].mxu0 }
 0x217   : > { %v800_v46 = vpop.f32.mrb[2].mxu0 }
 0x218   : > { %883 = vrot.lane.b32.xlu0 %v798_v44, %s3719_s8  ;;  %v3158_v47 = vpop.f32.mrb[3].mxu0  ;;  %v892_v48 = vpack.c.bf16 %v798_v44, %v798_v44 }
 0x21a   : > { %v915_v49 = vsel %vm910_vm5, %v892_v48, 0 }
 0x21b   : > { %3168 = vmatpush3.bf16.xpose.msra.mxu0 %v915_v49 }
 0x21c   : > { %886 = vrot.lane.b32.xlu0 %v798_v44, %s3720_s27  ;;  %3179 = vmatprep.subr.bf16.mxu0 %v3717_v7 }
 0x21d   : > { %v732_v51 = vpop.f32.mrb[12].mxu1 }
 0x21e   : > { %v733_v52 = vadd.f32 %v2929_v50, %v732_v51  ;;  %v3149_v53 = vpop.f32.mrb[13].mxu1 }
 0x21f   : > { %v735_v54 = vpop.f32.mrb[14].mxu1 }
 0x220   : > { %v878_v55 = vpack.c.bf16 %v733_v52, %v733_v52  ;;  %872 = vrot.lane.b32.xlu0 %v733_v52, %s3720_s27  ;;  %869 = vrot.lane.b32.xlu1 %v733_v52, %s3719_s8  ;;  %v3150_v56 = vpop.f32.mrb[15].mxu1 }
 0x222   : > { %3170 = vmatmul.mubr.msk.bf16.vlgmr.msra.gmra.mrb[4].mxu0 %vm910_vm5, %v878_v55 }
 0x223   : > { %3181 = vmatprep.mubr.msk.bf16.mxu0 %vm3718_vm3, %v3717_v7 }
 0x224   : > { %889 = vrot.lane.b32.xlu1 %v798_v44, %s3721_s9 }
 0x225   : > { %v862_v58 = vpop.f32.mrb[16].mxu1 }
 0x226   : > { %v3165_v59 = vpop.f32.mrb[17].mxu1  ;;  %v4037_v61 = vadd.f32 %v2945_v57, %v862_v58 }
 0x227   : > { %v865_v60 = vpop.f32.mrb[18].mxu1 }
 0x228   : > { %875 = vrot.lane.b32.xlu1 %v733_v52, %s3721_s9  ;;  %v3166_v62 = vpop.f32.mrb[19].mxu1  ;;  %v906_v8 = vpack.c.bf16 %v4037_v61, %v4037_v61 }
 0x22a   : > { %v1169_v14 = vsel %vm1167_vm6, %v906_v8, 0 }
 0x22c   : > { %897 = vrot.lane.b32.xlu1 %v4037_v61, %s3719_s8 }
 0x28a   : > { %v884_v63 = vpop.permute.xlu0 %883 }
 0x28b   : > { %v893_v0 = vpack.c.bf16 %v884_v63, %v884_v63 }
 0x28d   : > { %v961_v1 = vsel %vm910_vm5, %v893_v0, 0 }
 0x28e   : > { %v887_v2 = vpop.permute.xlu0 %886  ;;  %3174 = vmatpush3.bf16.xpose.msra.mxu1 %v961_v1 }
 0x28f   : > { %v894_v3 = vpack.c.bf16 %v887_v2, %v887_v2  ;;  %3185 = vmatprep.subr.bf16.mxu1 %v3717_v7 }
 0x291   : > { %v1007_v4 = vsel %vm910_vm5, %v894_v3, 0 }
 0x292   : > { %v870_v5 = vpop.permute.xlu1 %869  ;;  %3180 = vmatpush3.bf16.xpose.msra.mxu0 %v1007_v4  ;;  %v873_v10 = vpop.permute.xlu0 %872 }
 0x293   : > { %v879_v6 = vpack.c.bf16 %v870_v5, %v870_v5  ;;  %3191 = vmatprep.subr.bf16.mxu0 %v3717_v7  ;;  %v880_v12 = vpack.c.bf16 %v873_v10, %v873_v10  ;;  %v2957_v10 = vld [vmem:[%s3913_s23 + $0x60] sm:$0xf] }
 0x295   : > { %3176 = vmatmul.mubr.msk.bf16.vlgmr.msra.gmra.mrb[20].mxu1 %vm910_vm5, %v879_v6 }
 0x296   : > { %v890_v11 = vpop.permute.xlu1 %889  ;;  %3187 = vmatprep.mubr.msk.bf16.mxu1 %vm3718_vm3, %v3717_v7 }
 0x297   : > { %v895_v13 = vpack.c.bf16 %v890_v11, %v890_v11 }
 0x299   : > { %v1053_v15 = vsel %vm910_vm5, %v895_v13, 0  ;;  %3182 = vmatmul.mubr.msk.bf16.vlgmr.msra.gmra.mrb[8].mxu0 %vm910_vm5, %v880_v12 }
 0x29a   : > { %3186 = vmatpush3.bf16.xpose.msra.mxu1 %v1053_v15  ;;  %v876_v16 = vpop.permute.xlu1 %875  ;;  %3192 = vmatpush3.bf16.msra.mxu0 %v1169_v14 }
 0x29b   : > { %3197 = vmatprep.subr.bf16.mxu1 %v3717_v7  ;;  %3193 = vmatprep.mubr.msk.bf16.mxu0 %vm3718_vm3, %v3717_v7  ;;  %v881_v18 = vpack.c.bf16 %v876_v16, %v876_v16  ;;  %v1374_v16 = vsel %vm1167_vm6, %v2957_v10, 0 }
 0x29c   : > { %3203 = vmatprep.subr.bf16.mxu0 %v3717_v7 }
 0x29e   : > { %v898_v17 = vpop.permute.xlu1 %897 }
 0x29f   : > { %v907_v19 = vpack.c.bf16 %v898_v17, %v898_v17 }
 0x2a1   : > { %3188 = vmatmul.mubr.msk.bf16.vlgmr.msra.gmra.mrb[24].mxu1 %vm910_vm5, %v881_v18  ;;  %v1215_v20 = vsel %vm1167_vm6, %v907_v19, 0 }
 0x2a2   : > { %3198 = vmatpush3.bf16.msra.mxu1 %v1215_v20  ;;  %3199 = vmatprep.mubr.msk.bf16.mxu1 %vm3718_vm3, %v3717_v7 }
 0x2a3   : > { %3209 = vmatprep.subr.bf16.mxu1 %v3717_v7 }
 0x2f5   : > { %v951_v21 = vpop.f32.mrb[4].mxu0 }
 0x2f6   : > { %v1095_v23 = vmul.f32 0.35355338, %v951_v21  ;;  %v3171_v24 = vpop.f32.mrb[5].mxu0 }
 0x2f7   : > { %v954_v25 = vpop.f32.mrb[6].mxu0 }
 0x2f8   : > { %v3172_v26 = vpop.f32.mrb[7].mxu0  ;;  %v1100_v27 = vadd.f32 %v1099_v22, %v1095_v23 }
 0x2f9   : > { %v2958_v26 = vld [vmem:[%s3913_s23 + $0x64] sm:$0xf] }
 0x2fa   : > { %v1104_v28 = vsel %vm910_vm5, %v1100_v27, -inf }
 0x2fb   : > { %1105 = vmax.xlane.f32.xlu0 %v1104_v28 }
 0x368   : > { %v997_v29 = vpop.f32.mrb[20].mxu1 }
 0x369   : > { %v1096_v30 = vmul.f32 0.35355338, %v997_v29  ;;  %v3177_v31 = vpop.f32.mrb[21].mxu1 }
 0x36a   : > { %v1000_v32 = vpop.f32.mrb[22].mxu1 }
 0x36b   : > { %v3178_v33 = vpop.f32.mrb[23].mxu1  ;;  %v1101_v34 = vadd.f32 %v1099_v22, %v1096_v30 }
 0x36c   : > { %v1043_v35 = vpop.f32.mrb[8].mxu0  ;;  %v2959_v33 = vld [vmem:[%s3913_s23 + $0x68] sm:$0xf] }
 0x36d   : > { %v1097_v36 = vmul.f32 0.35355338, %v1043_v35  ;;  %v3183_v37 = vpop.f32.mrb[9].mxu0  ;;  %v1107_v38 = vsel %vm910_vm5, %v1101_v34, -inf }
 0x36e   : > { %v1046_v39 = vpop.f32.mrb[10].mxu0  ;;  %1108 = vmax.xlane.f32.xlu1 %v1107_v38  ;;  %v1466_v37 = vsel %vm1167_vm6, %v2959_v33, 0 }
 0x36f   : > { %v3184_v40 = vpop.f32.mrb[11].mxu0  ;;  %v1102_v41 = vadd.f32 %v1099_v22, %v1097_v36 }
 0x371   : > { %v1110_v42 = vsel %vm910_vm5, %v1102_v41, -inf }
 0x372   : > { %1111 = vmax.xlane.f32.xlu0 %v1110_v42 }
 0x374   : > { %v1089_v43 = vpop.f32.mrb[24].mxu1 }
 0x375   : > { %v1098_v44 = vmul.f32 0.35355338, %v1089_v43  ;;  %v3189_v45 = vpop.f32.mrb[25].mxu1 }
 0x376   : > { %v1092_v46 = vpop.f32.mrb[26].mxu1 }
 0x377   : > { %v3190_v47 = vpop.f32.mrb[27].mxu1  ;;  %v1103_v48 = vadd.f32 %v1099_v22, %v1098_v44 }
 0x379   : > { %v1113_v49 = vsel %vm910_vm5, %v1103_v48, -inf }
 0x37a   : > { %1114 = vmax.xlane.f32.xlu0 %v1113_v49 }
 0x37f   : > { %903 = vrot.lane.b32.xlu1 %v4037_v61, %s3721_s9 }
 0x388   : > { %v1106_v50 = vpop.xlane.xlu0 %1105 }
 0x389   : > { %v1128_v51 = vsub.f32 %v1100_v27, %v1106_v50  ;;  %v1116_v20 = vsub.f32 -inf, %v1106_v50  ;;  %v1420_v27 = vsel %vm1167_vm6, %v2958_v26, 0 }
 0x38b   : > { %v1132_v52 = vmul.f32 1.442695, %v1128_v51  ;;  %v1120_v21 = vmul.f32 1.442695, %v1116_v20 }
 0x38d   : > { %3505 = vpow2.f32 %v1132_v52 }
 0x390   : > { %900 = vrot.lane.b32.xlu0 %v4037_v61, %s3720_s27 }
 0x397   : > { %v3506_v53 = vpop.eup %3505 }
 0x398   : > { %v1160_v54 = vpack.c.bf16 %v3506_v53, %v3506_v53  ;;  %v1144_v55 = vsel %vm910_vm5, %v3506_v53, 0.0 }
 0x39a   : > { %3194 = vmatmul.mubr.msk.bf16.vlgmr.msra.gmra.mrb[12].mxu0 %vm910_vm5, %v1160_v54 }
 0x39b   : > { %3205 = vmatprep.mubr.msk.bf16.mxu0 %vm3718_vm3, %v3717_v7 }
 0x3a3   : > { %1145 = vadd.xlane.f32.xlu1 %v1144_v55 }
 0x3fb   : > { %v4074_v56 = vpop.xlane.xlu1 %1108 }
 0x3fc   : > { %v1129_v57 = vsub.f32 %v1101_v34, %v4074_v56  ;;  %v1117_v38 = vsub.f32 -inf, %v4074_v56 }
 0x3fe   : > { %v1134_v58 = vmul.f32 1.442695, %v1129_v57  ;;  %v1122_v39 = vmul.f32 1.442695, %v1117_v38 }
 0x3ff   : > { %v4077_v59 = vpop.xlane.xlu0 %1111  ;;  %v904_v62 = vpop.permute.xlu1 %903 }
 0x400   : > { %v1130_v60 = vsub.f32 %v1102_v41, %v4077_v59  ;;  %3507 = vpow2.f32 %v1134_v58  ;;  %v909_v1 = vpack.c.bf16 %v904_v62, %v904_v62  ;;  %v1118_v40 = vsub.f32 -inf, %v4077_v59 }
 0x402   : > { %v1136_v61 = vmul.f32 1.442695, %v1130_v60  ;;  %v1307_v11 = vsel %vm1167_vm6, %v909_v1, 0  ;;  %v1124_v41 = vmul.f32 1.442695, %v1118_v40 }
 0x404   : > { %3509 = vpow2.f32 %v1136_v61  ;;  %v2960_v61 = vld [vmem:[%s3913_s23 + $0x6c] sm:$0xf] }
 0x407   : > { %v4080_v63 = vpop.xlane.xlu0 %1114 }
 0x408   : > { %v1131_v0 = vsub.f32 %v1103_v48, %v4080_v63  ;;  %v1119_v42 = vsub.f32 -inf, %v4080_v63 }
 0x40a   : > { %v1138_v2 = vmul.f32 1.442695, %v1131_v0  ;;  %v3508_v3 = vpop.eup %3507  ;;  %v1126_v43 = vmul.f32 1.442695, %v1119_v42 }
 0x40b   : > { %v901_v4 = vpop.permute.xlu0 %900  ;;  %v1147_v6 = vsel %vm910_vm5, %v3508_v3, 0.0  ;;  %v1161_v8 = vpack.c.bf16 %v3508_v3, %v3508_v3 }
 0x40c   : > { %v908_v5 = vpack.c.bf16 %v901_v4, %v901_v4  ;;  %3511 = vpow2.f32 %v1138_v2  ;;  %1148 = vadd.xlane.f32.xlu0 %v1147_v6  ;;  %v1512_v4 = vsel %vm1167_vm6, %v2960_v61, 0 }
 0x40d   : > { %3200 = vmatmul.mubr.msk.bf16.vlgmr.msra.gmra.mrb[28].mxu1 %vm910_vm5, %v1161_v8  ;;  %3513 = vpow2.f32 %v1120_v21 }
 0x40e   : > { %v1261_v12 = vsel %vm1167_vm6, %v908_v5, 0  ;;  %v3510_v13 = vpop.eup %3509  ;;  %3210 = vmatpush3.bf16.msra.mxu1 %v1307_v11  ;;  %3211 = vmatprep.mubr.msk.bf16.mxu1 %vm3718_vm3, %v3717_v7 }
 0x40f   : > { %3204 = vmatpush3.bf16.msra.mxu0 %v1261_v12  ;;  %v1150_v14 = vsel %vm910_vm5, %v3510_v13, 0.0  ;;  %v1162_v15 = vpack.c.bf16 %v3510_v13, %v3510_v13  ;;  %3221 = vmatprep.subr.bf16.mxu1 %v3717_v7 }
 0x410   : > { %3215 = vmatprep.subr.bf16.mxu0 %v3717_v7  ;;  %1151 = vadd.xlane.f32.xlu0 %v1150_v14 }
 0x412   : > { %3206 = vmatmul.mubr.msk.bf16.vlgmr.msra.gmra.mrb[16].mxu0 %vm910_vm5, %v1162_v15 }
 0x413   : > { %3216 = vmatpush3.bf16.msra.mxu0 %v1374_v16  ;;  %3217 = vmatprep.mubr.msk.bf16.mxu0 %vm3718_vm3, %v3717_v7 }
 0x414   : > { %3227 = vmatprep.subr.bf16.mxu0 %v3717_v7 }
 0x416   : > { %v3512_v17 = vpop.eup %3511 }
 0x417   : > { %v1153_v18 = vsel %vm910_vm5, %v3512_v17, 0.0  ;;  %v1163_v19 = vpack.c.bf16 %v3512_v17, %v3512_v17  ;;  %v3514_v22 = vpop.eup %3513 }
 0x418   : > { %1154 = vadd.xlane.f32.xlu1 %v1153_v18  ;;  %v1140_v24 = vmul.f32 0.0, %v3514_v22 }
 0x419   : > { %3212 = vmatmul.mubr.msk.bf16.vlgmr.msra.gmra.mrb[32].mxu1 %vm910_vm5, %v1163_v19 }
 0x41a   : > { %3223 = vmatprep.mubr.msk.bf16.mxu1 %vm3718_vm3, %v3717_v7  ;;  %3222 = vmatpush3.bf16.msra.mxu1 %v1420_v27 }
 0x41b   : > { %3233 = vmatprep.subr.bf16.mxu1 %v3717_v7 }
 0x430   : > { %v1146_v23 = vpop.xlane.xlu1 %1145 }
 0x431   : > { %v1156_v25 = vadd.f32 %v1146_v23, %v1140_v24 }
 0x433   : > { %3515 = vrcp.f32 %v1156_v25 }
 0x434   : > { %3517 = vpow2.f32 %v1122_v39  ;;  %v2965_v39 = vld [vmem:[%s3961_s26 + $0x6] ss:$0 sm:$0xff] }
 0x435   : > { %3519 = vpow2.f32 %v1124_v41 }
 0x436   : > { %3521 = vpow2.f32 %v1126_v43 }
 0x43d   : > { %v3516_v31 = vpop.eup %3515 }
 0x43e   : > { %v3518_v44 = vpop.eup %3517 }
 0x43f   : > { %v1141_v46 = vmul.f32 0.0, %v3518_v44  ;;  %v3520_v47 = vpop.eup %3519 }
 0x440   : > { %v1142_v50 = vmul.f32 0.0, %v3520_v47  ;;  %v3522_v52 = vpop.eup %3521 }
 0x441   : > { %v1143_v54 = vmul.f32 0.0, %v3522_v52  ;;  %v3489_v52 = vld [vmem:[%s3913_s23 + $0x80] sm:$0xff]  }
 0x46d   : > { %v1205_v28 = vpop.f32.mrb[12].mxu0 }
 0x46e   : > { %v1349_v29 = vadd.f32 %v1205_v28, %v1140_v24  ;;  %v3195_v30 = vpop.f32.mrb[13].mxu0 }
 0x46f   : > { %v1208_v32 = vpop.f32.mrb[14].mxu0 }
 0x470   : > { %v1357_v34 = vmul.f32 %v3516_v31, %v1349_v29  ;;  %v3196_v35 = vpop.f32.mrb[15].mxu0 }
 0x472   : > { %v1366_v36 = vpack.c.bf16 %v1357_v34, %v1357_v34 }
 0x474   : > { %3218 = vmatmul.mubr.msk.bf16.vlgmr.msra.gmra.mrb[20].mxu0 %vm910_vm5, %v1366_v36 }
 0x475   : > { %3228 = vmatpush3.bf16.msra.mxu0 %v1466_v37  ;;  %3229 = vmatprep.mubr.msk.bf16.mxu0 %vm3718_vm3, %v3717_v7 }
 0x476   : > { %3239 = vmatprep.subr.bf16.mxu0 %v3717_v7 }
 0x499   : > { %v1149_v45 = vpop.xlane.xlu0 %1148 }
 0x49a   : > { %v1157_v48 = vadd.f32 %v1149_v45, %v1141_v46 }
 0x49c   : > { %3523 = vrcp.f32 %v1157_v48 }
 0x49d   : > { %v1152_v49 = vpop.xlane.xlu0 %1151 }
 0x49e   : > { %v1158_v51 = vadd.f32 %v1152_v49, %v1142_v50 }
 0x4a0   : > { %3525 = vrcp.f32 %v1158_v51 }
 0x4a5   : > { %v1155_v53 = vpop.xlane.xlu1 %1154 }
 0x4a6   : > { %v1159_v55 = vadd.f32 %v1155_v53, %v1143_v54  ;;  %v3524_v59 = vpop.eup %3523  ;;  %v3490_v53 = vld [vmem:[%s3913_s23 + $0x70] sm:$0xff]  }
 0x4a8   : > { %3527 = vrcp.f32 %v1159_v55  ;;  %v479_v55 = vld [vmem:[%s3934_s16] sm:$0xf]  ;;  %s4418_s16 = sand.u32 1, %s3675_s28  }
 0x4a9   : > { %s2714_s25 = scalar_lea.sflag [#allocation5], %s4418_s16 }
 0x4aa   : > { %v3526_v5 = vpop.eup %3525 }
 0x4b2   : > { %v3528_v15 = vpop.eup %3527 }
 0x4e0   : > { %v1251_v56 = vpop.f32.mrb[28].mxu1 }
 0x4e1   : > { %v1350_v57 = vadd.f32 %v1251_v56, %v1141_v46  ;;  %v3201_v58 = vpop.f32.mrb[29].mxu1 }
 0x4e2   : > { %v1254_v60 = vpop.f32.mrb[30].mxu1 }
 0x4e3   : > { %v1358_v62 = vmul.f32 %v3524_v59, %v1350_v57  ;;  %v3202_v63 = vpop.f32.mrb[31].mxu1  ;;  %v2966_v60 = vld [vmem:[%s3961_s26 + $0xc] ss:$0 sm:$0xff] }
 0x4e5   : > { %v1297_v0 = vpop.f32.mrb[16].mxu0  ;;  %v1367_v1 = vpack.c.bf16 %v1358_v62, %v1358_v62  ;;  %v2967_v62 = vld [vmem:[%s3961_s26 + $0xd] ss:$0 sm:$0xff] }
 0x4e6   : > { %v1351_v2 = vadd.f32 %v1297_v0, %v1142_v50  ;;  %v3207_v3 = vpop.f32.mrb[17].mxu0 }
 0x4e7   : > { %v1300_v6 = vpop.f32.mrb[18].mxu0  ;;  %3224 = vmatmul.mubr.msk.bf16.vlgmr.msra.gmra.mrb[36].mxu1 %vm910_vm5, %v1367_v1 }
 0x4e8   : > { %v1359_v8 = vmul.f32 %v3526_v5, %v1351_v2  ;;  %v3208_v10 = vpop.f32.mrb[19].mxu0  ;;  %3234 = vmatpush3.bf16.msra.mxu1 %v1512_v4  ;;  %3235 = vmatprep.mubr.msk.bf16.mxu1 %vm3718_vm3, %v3717_v7  ;;  %v3493_v6 = vld [vmem:[%s3913_s23 + $0x90] sm:$0xff]  }
 0x4e9   : > { %3247 = vmatprep.subr.bf16.mxu1 %v3717_v7  ;;  %v480_v10 = vld [vmem:[%s3939_s3] sm:$0xf] }
 0x4ea   : > { %v1368_v11 = vpack.c.bf16 %v1359_v8, %v1359_v8  ;;  %v3494_v8 = vld [vmem:[%s3913_s23 + $0x98] sm:$0xff]  }
 0x4ec   : > { %3230 = vmatmul.mubr.msk.bf16.vlgmr.msra.gmra.mrb[24].mxu0 %vm910_vm5, %v1368_v11  ;;  %v1343_v12 = vpop.f32.mrb[32].mxu1  ;;  %v2980_v11 = vld [vmem:[%s3961_s26 + $0x8] ss:$0 sm:$0xff] }
 0x4ed   : > { %3243 = vmatprep.mubr.msk.bf16.mxu0 %vm3718_vm3, %v3717_v7  ;;  %v1352_v13 = vadd.f32 %v1343_v12, %v1143_v54  ;;  %v3213_v14 = vpop.f32.mrb[33].mxu1  ;;  %v3491_v54 = vld [vmem:[%s3913_s23 + $0x88] sm:$0xff]   ;;  %3240 = vmatpush3.bf16.msra.mxu0 %v3490_v53 }
 0x4ee   : > { %v1346_v16 = vpop.f32.mrb[34].mxu1  ;;  %3241 = vmatprep.subr.bf16.mxu0 %v3717_v7 }
 0x4ef   : > { %v1360_v17 = vmul.f32 %v3528_v15, %v1352_v13  ;;  %v3214_v18 = vpop.f32.mrb[35].mxu1  ;;  %v2972_v13 = vld [vmem:[%s3961_s26 + $0x7] ss:$0 sm:$0xff] }
 0x4f1   : > { %v1369_v19 = vpack.c.bf16 %v1360_v17, %v1360_v17 }
 0x4f3   : > { %3236 = vmatmul.mubr.msk.bf16.vlgmr.msra.gmra.mrb[40].mxu1 %vm910_vm5, %v1369_v19 }
 0x4f4   : > { %3251 = vmatprep.mubr.msk.bf16.mxu1 %vm3718_vm3, %v3717_v7  ;;  %3248 = vmatpush3.bf16.msra.mxu1 %v3489_v52 }
 0x4f5   : > { %3249 = vmatprep.subr.bf16.mxu1 %v3717_v7 }
 0x4f8   : > { %3250 = vmatpush3.bf16.msra.mxu1 %v3491_v54 }
 0x4f9   : > { %3263 = vmatprep.subr.bf16.mxu1 %v3717_v7 }
 0x547   : > { %v1410_v20 = vpop.f32.mrb[20].mxu0 }
 0x548   : > { %v3219_v21 = vpop.f32.mrb[21].mxu0  ;;  %v1554_v25 = vsel %vm502_vm4, %v1410_v20, 0.0 }
 0x549   : > { %v1413_v22 = vpop.f32.mrb[22].mxu0 }
 0x54a   : > { %v3220_v23 = vpop.f32.mrb[23].mxu0 }
 0x5ba   : > { %v1456_v24 = vpop.f32.mrb[36].mxu1 }
 0x5bb   : > { %v1555_v26 = vsel %vm502_vm4, %v1456_v24, 0.0  ;;  %v3225_v27 = vpop.f32.mrb[37].mxu1 }
 0x5bc   : > { %v1556_v28 = vadd.f32 %v1555_v26, %v1554_v25  ;;  %v1459_v29 = vpop.f32.mrb[38].mxu1  ;;  %v2988_v26 = vld [vmem:[%s3961_s26 + $0x9] ss:$0 sm:$0xff] }
 0x5bd   : > { %v3226_v30 = vpop.f32.mrb[39].mxu1 }
 0x5bf   : > { %v1502_v31 = vpop.f32.mrb[24].mxu0 }
 0x5c0   : > { %v1557_v32 = vsel %vm502_vm4, %v1502_v31, 0.0  ;;  %v3231_v33 = vpop.f32.mrb[25].mxu0 }
 0x5c1   : > { %v1558_v34 = vadd.f32 %v1557_v32, %v1556_v28  ;;  %v1505_v35 = vpop.f32.mrb[26].mxu0 }
 0x5c2   : > { %v3232_v36 = vpop.f32.mrb[27].mxu0 }
 0x5c6   : > { %v1548_v37 = vpop.f32.mrb[40].mxu1 }
 0x5c7   : > { %v1559_v38 = vsel %vm502_vm4, %v1548_v37, 0.0  ;;  %v3237_v40 = vpop.f32.mrb[41].mxu1 }
 0x5c8   : > { %v1560_v41 = vadd.f32 %v1559_v38, %v1558_v34  ;;  %v1551_v42 = vpop.f32.mrb[42].mxu1 }
 0x5c9   : > { %v3238_v43 = vpop.f32.mrb[43].mxu1 }
 0x5ca   : > { %v1566_v44 = vadd.f32 %v2965_v39, %v1560_v41 }
 0x5cc   : > { %v1567_v45 = vadd.f32 %v1566_v44, %v3974_v9  ;;  %v3492_v9 = vld [vmem:[%s3913_s23 + $0x78] sm:$0xff]  }
 0x5cd   : > { %3242 = vmatpush3.bf16.msra.mxu0 %v3492_v9 }
 0x5ce   : > { %v1568_v46 = vsel %vm502_vm4, %v1567_v45, 0.0  ;;  %3255 = vmatprep.subr.bf16.mxu0 %v3717_v7 }
 0x5cf   : > { %1569 = vadd.xlane.f32.xlu0 %v1568_v46 }
 0x5d0   : > { %3244 = vmatmul.mubr.msk.bf16.vlgmr.msra.gmra.mrb[28].mxu0 %vm502_vm4, %v479_v55 }
 0x5d1   : > { %3259 = vmatprep.mubr.msk.bf16.mxu0 %vm3718_vm3, %v3717_v7  ;;  %3256 = vmatpush3.bf16.msra.mxu0 %v3493_v6 }
 0x5d2   : > { %3257 = vmatprep.subr.bf16.mxu0 %v3717_v7 }
 0x5d5   : > { %3258 = vmatpush3.bf16.msra.mxu0 %v3494_v8 }
 0x5d6   : > { %3269 = vmatprep.subr.bf16.mxu0 %v3717_v7 }
 0x5d8   : > { %3260 = vmatmul.mubr.msk.bf16.vlgmr.msra.gmra.mrb[32].mxu0 %vm502_vm4, %v480_v10 }
 0x5d9   : > { %3271 = vmatprep.mubr.msk.bf16.mxu0 %vm3718_vm3, %v3717_v7 }
 0x65c   : > { %v1570_v47 = vpop.xlane.xlu0 %1569 }
 0x65d   : > { %v1572_v48 = vmul.f32 0.03125, %v1570_v47 }
 0x65f   : > { %v1573_v49 = vsub.f32 %v1567_v45, %v1572_v48 }
 0x661   : > { %v1574_v50 = vmul.f32 %v1573_v49, %v1573_v49 }
 0x663   : > { %v1575_v51 = vsel %vm502_vm4, %v1574_v50, 0.0 }
 0x664   : > { %1576 = vadd.xlane.f32.xlu1 %v1575_v51 }
 0x6a3   : > { %v1654_v2 = vpop.f32.mrb[28].mxu0 }
 0x6a4   : > { %v3245_v3 = vpop.f32.mrb[29].mxu0  ;;  %v1655_v18 = vadd.f32 %v2972_v13, %v1654_v2 }
 0x6a5   : > { %v1657_v4 = vpop.f32.mrb[30].mxu0 }
 0x6a6   : > { %v3246_v5 = vpop.f32.mrb[31].mxu0  ;;  %v1800_v21 = vpack.c.bf16 %v1655_v18, %v1655_v18 }
 0x6ab   : > { %v1784_v22 = vpop.f32.mrb[32].mxu0 }
 0x6ac   : > { %v3261_v23 = vpop.f32.mrb[33].mxu0  ;;  %v1785_v31 = vadd.f32 %v2988_v26, %v1784_v22 }
 0x6ad   : > { %v1787_v24 = vpop.f32.mrb[34].mxu0 }
 0x6ae   : > { %v3262_v25 = vpop.f32.mrb[35].mxu0  ;;  %v1828_v36 = vpack.c.bf16 %v1785_v31, %v1785_v31 }
 0x6b0   : > { %v2084_v41 = vsel %vm1167_vm6, %v1828_v36, 0 }
 0x6f1   : > { %v1577_v56 = vpop.xlane.xlu1 %1576 }
 0x6f2   : > { %v1578_v57 = vmul.f32 0.03125, %v1577_v56 }
 0x6f4   : > { %v1579_v58 = vadd.f32 1e-05, %v1578_v57 }
 0x6f6   : > { %3529 = vrsqrt.f32 %v1579_v58 }
 0x700   : > { %v3530_v59 = vpop.eup %3529 }
 0x701   : > { %v1581_v61 = vmul.f32 %v3530_v59, %v1573_v49 }
 0x703   : > { %v1587_v63 = vmul.f32 %v2966_v60, %v1581_v61 }
 0x705   : > { %v4148_v0 = vadd.f32 %v2967_v62, %v1587_v63 }
 0x707   : > { %v1594_v1 = vpack.c.bf16 %v4148_v0, %v4148_v0 }
 0x709   : > { %3252 = vmatmul.mubr.msk.bf16.vlgmr.msra.gmra.mrb[44].mxu1 %vm502_vm4, %v1594_v1 }
 0x70a   : > { %3265 = vmatprep.mubr.msk.bf16.mxu1 %vm3718_vm3, %v3717_v7 }
 0x7dc   : > { %v1719_v12 = vpop.f32.mrb[44].mxu1 }
 0x7dd   : > { %v1720_v14 = vadd.f32 %v2980_v11, %v1719_v12  ;;  %v3253_v15 = vpop.f32.mrb[45].mxu1 }
 0x7de   : > { %v1722_v16 = vpop.f32.mrb[46].mxu1 }
 0x7df   : > { %1808 = vrot.lane.b32.xlu1 %v1720_v14, %s3720_s27  ;;  %1805 = vrot.lane.b32.xlu0 %v1720_v14, %s3719_s8  ;;  %v3254_v17 = vpop.f32.mrb[47].mxu1  ;;  %v1814_v19 = vpack.c.bf16 %v1720_v14, %v1720_v14 }
 0x7e1   : > { %v1836_v20 = vsel %vm910_vm5, %v1814_v19, 0 }
 0x7e2   : > { %3264 = vmatpush3.bf16.xpose.msra.mxu1 %v1836_v20 }
 0x7e3   : > { %1791 = vrot.lane.b32.xlu1 %v1655_v18, %s3719_s8  ;;  %1811 = vrot.lane.b32.xlu0 %v1720_v14, %s3721_s9 }
 0x7e4   : > { %3275 = vmatprep.subr.bf16.mxu1 %v3717_v7 }
 0x7e7   : > { %1794 = vrot.lane.b32.xlu1 %v1655_v18, %s3720_s27  ;;  %1797 = vrot.lane.b32.xlu0 %v1655_v18, %s3721_s9 }
 0x7e9   : > { %3266 = vmatmul.mubr.msk.bf16.vlgmr.msra.gmra.mrb[48].mxu1 %vm910_vm5, %v1800_v21 }
 0x7ea   : > { %3277 = vmatprep.mubr.msk.bf16.mxu1 %vm3718_vm3, %v3717_v7 }
 0x851   : > { %v1809_v27 = vpop.permute.xlu1 %1808  ;;  %v1806_v28 = vpop.permute.xlu0 %1805 }
 0x852   : > { %v1816_v29 = vpack.c.bf16 %v1809_v27, %v1809_v27  ;;  %v1815_v30 = vpack.c.bf16 %v1806_v28, %v1806_v28 }
 0x854   : > { %v1928_v32 = vsel %vm910_vm5, %v1816_v29, 0  ;;  %v1882_v33 = vsel %vm910_vm5, %v1815_v30, 0 }
 0x855   : > { %v1792_v34 = vpop.permute.xlu1 %1791  ;;  %3270 = vmatpush3.bf16.xpose.msra.mxu0 %v1882_v33  ;;  %v1812_v35 = vpop.permute.xlu0 %1811  ;;  %3276 = vmatpush3.bf16.xpose.msra.mxu1 %v1928_v32  ;;  %v3000_v33 = vld [vmem:[%s3913_s23 + $0xa0] sm:$0xf] }
 0x856   : > { %3281 = vmatprep.subr.bf16.mxu0 %v3717_v7  ;;  %3287 = vmatprep.subr.bf16.mxu1 %v3717_v7  ;;  %v1801_v37 = vpack.c.bf16 %v1792_v34, %v1792_v34  ;;  %v1817_v38 = vpack.c.bf16 %v1812_v35, %v1812_v35 }
 0x858   : > { %v1974_v42 = vsel %vm910_vm5, %v1817_v38, 0  ;;  %v2289_v38 = vsel %vm1167_vm6, %v3000_v33, 0 }
 0x859   : > { %v1795_v39 = vpop.permute.xlu1 %1794  ;;  %v1798_v43 = vpop.permute.xlu0 %1797 }
 0x85a   : > { %v1802_v40 = vpack.c.bf16 %v1795_v39, %v1795_v39  ;;  %v1803_v44 = vpack.c.bf16 %v1798_v43, %v1798_v43 }
 0x85c   : > { %3272 = vmatmul.mubr.msk.bf16.vlgmr.msra.gmra.mrb[36].mxu0 %vm910_vm5, %v1801_v37  ;;  %3278 = vmatmul.mubr.msk.bf16.vlgmr.msra.gmra.mrb[52].mxu1 %vm910_vm5, %v1802_v40 }
 0x85d   : > { %3282 = vmatpush3.bf16.xpose.msra.mxu0 %v1974_v42  ;;  %3283 = vmatprep.mubr.msk.bf16.mxu0 %vm3718_vm3, %v3717_v7 }
 0x85e   : > { %3288 = vmatpush3.bf16.msra.mxu1 %v2084_v41  ;;  %3289 = vmatprep.mubr.msk.bf16.mxu1 %vm3718_vm3, %v3717_v7 }
 0x85f   : > { %3299 = vmatprep.subr.bf16.mxu1 %v3717_v7  ;;  %3293 = vmatprep.subr.bf16.mxu0 %v3717_v7 }
 0x864   : > { %3284 = vmatmul.mubr.msk.bf16.vlgmr.msra.gmra.mrb[40].mxu0 %vm910_vm5, %v1803_v44 }
 0x865   : > { %3295 = vmatprep.mubr.msk.bf16.mxu0 %vm3718_vm3, %v3717_v7 }
 0x8bc   : > { %v1872_v45 = vpop.f32.mrb[48].mxu1 }
 0x8bd   : > { %v2016_v46 = vmul.f32 0.35355338, %v1872_v45  ;;  %v3267_v47 = vpop.f32.mrb[49].mxu1 }
 0x8be   : > { %v1875_v48 = vpop.f32.mrb[50].mxu1 }
 0x8bf   : > { %v3268_v49 = vpop.f32.mrb[51].mxu1  ;;  %v2020_v50 = vsel %vm910_vm5, %v2016_v46, -inf  ;;  %v3001_v48 = vld [vmem:[%s3913_s23 + $0xa4] sm:$0xf] }
 0x8c0   : > { %2021 = vmax.xlane.f32.xlu1 %v2020_v50  ;;  %v2335_v49 = vsel %vm1167_vm6, %v3001_v48, 0 }
 0x8d1   : > { %1822 = vrot.lane.b32.xlu1 %v1785_v31, %s3720_s27 }
 0x92f   : > { %v1918_v51 = vpop.f32.mrb[36].mxu0  ;;  %v1964_v52 = vpop.f32.mrb[52].mxu1 }
 0x930   : > { %v2017_v53 = vmul.f32 0.35355338, %v1918_v51  ;;  %v3273_v54 = vpop.f32.mrb[37].mxu0  ;;  %v3279_v9 = vpop.f32.mrb[53].mxu1  ;;  %v2018_v57 = vmul.f32 0.35355338, %v1964_v52 }
 0x931   : > { %v1921_v55 = vpop.f32.mrb[38].mxu0  ;;  %v1967_v56 = vpop.f32.mrb[54].mxu1  ;;  %v3002_v9 = vld [vmem:[%s3913_s23 + $0xa8] sm:$0xf] }
 0x932   : > { %v3274_v58 = vpop.f32.mrb[39].mxu0  ;;  %v3280_v59 = vpop.f32.mrb[55].mxu1  ;;  %v2023_v60 = vsel %vm910_vm5, %v2017_v53, -inf  ;;  %v2026_v61 = vsel %vm910_vm5, %v2018_v57, -inf }
 0x933   : > { %2024 = vmax.xlane.f32.xlu0 %v2023_v60  ;;  %v2381_v58 = vsel %vm1167_vm6, %v3002_v9, 0 }
 0x937   : > { %v2010_v62 = vpop.f32.mrb[40].mxu0  ;;  %2027 = vmax.xlane.f32.xlu0 %v2026_v61 }
 0x938   : > { %v2019_v63 = vmul.f32 0.35355338, %v2010_v62  ;;  %v3285_v1 = vpop.f32.mrb[41].mxu0 }
 0x939   : > { %v2013_v2 = vpop.f32.mrb[42].mxu0 }
 0x93a   : > { %v3286_v3 = vpop.f32.mrb[43].mxu0  ;;  %v2029_v4 = vsel %vm910_vm5, %v2019_v63, -inf }
 0x93b   : > { %2030 = vmax.xlane.f32.xlu1 %v2029_v4 }
 0x94c   : > { %1825 = vrot.lane.b32.xlu1 %v1785_v31, %s3721_s9 }
 0x94d   : > { %v2022_v5 = vpop.xlane.xlu1 %2021  ;;  %1819 = vrot.lane.b32.xlu0 %v1785_v31, %s3719_s8 }
 0x94e   : > { %v2044_v6 = vsub.f32 %v2016_v46, %v2022_v5  ;;  %v2032_v42 = vsub.f32 -inf, %v2022_v5 }
 0x950   : > { %v2048_v8 = vmul.f32 1.442695, %v2044_v6  ;;  %v2036_v43 = vmul.f32 1.442695, %v2032_v42 }
 0x951   : > { %v1823_v10 = vpop.permute.xlu1 %1822 }
 0x952   : > { %3531 = vpow2.f32 %v2048_v8  ;;  %v1830_v11 = vpack.c.bf16 %v1823_v10, %v1823_v10 }
 0x954   : > { %v2176_v14 = vsel %vm1167_vm6, %v1830_v11, 0 }
 0x95c   : > { %v3532_v12 = vpop.eup %3531 }
 0x95d   : > { %v2076_v13 = vpack.c.bf16 %v3532_v12, %v3532_v12  ;;  %v2060_v15 = vsel %vm910_vm5, %v3532_v12, 0.0 }
 0x95f   : > { %3290 = vmatmul.mubr.msk.bf16.vlgmr.msra.gmra.mrb[56].mxu1 %vm910_vm5, %v2076_v13 }
 0x960   : > { %3300 = vmatpush3.bf16.msra.mxu1 %v2176_v14  ;;  %3301 = vmatprep.mubr.msk.bf16.mxu1 %vm3718_vm3, %v3717_v7 }
 0x961   : > { %3311 = vmatprep.subr.bf16.mxu1 %v3717_v7 }
 0x96c   : > { %2061 = vadd.xlane.f32.xlu0 %v2060_v15 }
 0x9c0   : > { %v4207_v16 = vpop.xlane.xlu0 %2024 }
 0x9c1   : > { %v2045_v17 = vsub.f32 %v2017_v53, %v4207_v16  ;;  %v2033_v59 = vsub.f32 -inf, %v4207_v16 }
 0x9c3   : > { %v2050_v18 = vmul.f32 1.442695, %v2045_v17  ;;  %v2038_v60 = vmul.f32 1.442695, %v2033_v59 }
 0x9c4   : > { %v4210_v19 = vpop.xlane.xlu0 %2027 }
 0x9c5   : > { %v2046_v20 = vsub.f32 %v2018_v57, %v4210_v19  ;;  %3533 = vpow2.f32 %v2050_v18  ;;  %v2034_v61 = vsub.f32 -inf, %v4210_v19 }
 0x9c7   : > { %v2052_v21 = vmul.f32 1.442695, %v2046_v20  ;;  %v2040_v62 = vmul.f32 1.442695, %v2034_v61 }
 0x9c8   : > { %v4213_v22 = vpop.xlane.xlu1 %2030  ;;  %v1820_v23 = vpop.permute.xlu0 %1819 }
 0x9c9   : > { %v2047_v24 = vsub.f32 %v2019_v63, %v4213_v22  ;;  %v1829_v25 = vpack.c.bf16 %v1820_v23, %v1820_v23  ;;  %3535 = vpow2.f32 %v2052_v21  ;;  %v2035_v63 = vsub.f32 -inf, %v4213_v22  ;;  %v3003_v21 = vld [vmem:[%s3913_s23 + $0xac] sm:$0xf] }
 0x9cb   : > { %v2054_v26 = vmul.f32 1.442695, %v2047_v24  ;;  %v2130_v27 = vsel %vm1167_vm6, %v1829_v25, 0  ;;  %v2042_v1 = vmul.f32 1.442695, %v2035_v63 }
 0x9cc   : > { %v1826_v28 = vpop.permute.xlu1 %1825  ;;  %3294 = vmatpush3.bf16.msra.mxu0 %v2130_v27 }
 0x9cd   : > { %3305 = vmatprep.subr.bf16.mxu0 %v3717_v7  ;;  %3537 = vpow2.f32 %v2054_v26  ;;  %v1831_v29 = vpack.c.bf16 %v1826_v28, %v1826_v28  ;;  %v2427_v28 = vsel %vm1167_vm6, %v3003_v21, 0 }
 0x9ce   : > { %3539 = vpow2.f32 %v2036_v43 }
 0x9cf   : > { %v3534_v30 = vpop.eup %3533  ;;  %v2222_v34 = vsel %vm1167_vm6, %v1831_v29, 0 }
 0x9d0   : > { %v2063_v31 = vsel %vm910_vm5, %v3534_v30, 0.0  ;;  %v2077_v32 = vpack.c.bf16 %v3534_v30, %v3534_v30 }
 0x9d1   : > { %2064 = vadd.xlane.f32.xlu1 %v2063_v31 }
 0x9d2   : > { %3296 = vmatmul.mubr.msk.bf16.vlgmr.msra.gmra.mrb[44].mxu0 %vm910_vm5, %v2077_v32 }
 0x9d3   : > { %v3536_v35 = vpop.eup %3535  ;;  %3306 = vmatpush3.bf16.msra.mxu0 %v2222_v34  ;;  %3307 = vmatprep.mubr.msk.bf16.mxu0 %vm3718_vm3, %v3717_v7 }
 0x9d4   : > { %v2066_v36 = vsel %vm910_vm5, %v3536_v35, 0.0  ;;  %v2078_v37 = vpack.c.bf16 %v3536_v35, %v3536_v35  ;;  %3317 = vmatprep.subr.bf16.mxu0 %v3717_v7 }
 0x9d5   : > { %2067 = vadd.xlane.f32.xlu0 %v2066_v36 }
 0x9d6   : > { %3302 = vmatmul.mubr.msk.bf16.vlgmr.msra.gmra.mrb[60].mxu1 %vm910_vm5, %v2078_v37 }
 0x9d7   : > { %v3538_v39 = vpop.eup %3537  ;;  %3312 = vmatpush3.bf16.msra.mxu1 %v2289_v38  ;;  %3313 = vmatprep.mubr.msk.bf16.mxu1 %vm3718_vm3, %v3717_v7 }
 0x9d8   : > { %v2069_v40 = vsel %vm910_vm5, %v3538_v39, 0.0  ;;  %v2079_v41 = vpack.c.bf16 %v3538_v39, %v3538_v39  ;;  %3323 = vmatprep.subr.bf16.mxu1 %v3717_v7  ;;  %v3540_v44 = vpop.eup %3539 }
 0x9d9   : > { %2070 = vadd.xlane.f32.xlu0 %v2069_v40  ;;  %v2056_v46 = vmul.f32 0.0, %v3540_v44 }
 0x9da   : > { %3308 = vmatmul.mubr.msk.bf16.vlgmr.msra.gmra.mrb[48].mxu0 %vm910_vm5, %v2079_v41 }
 0x9db   : > { %3319 = vmatprep.mubr.msk.bf16.mxu0 %vm3718_vm3, %v3717_v7  ;;  %3318 = vmatpush3.bf16.msra.mxu0 %v2335_v49 }
 0x9dc   : > { %3329 = vmatprep.subr.bf16.mxu0 %v3717_v7 }
 0x9f9   : > { %v2062_v45 = vpop.xlane.xlu0 %2061 }
 0x9fa   : > { %v2072_v47 = vadd.f32 %v2062_v45, %v2056_v46 }
 0x9fc   : > { %3541 = vrcp.f32 %v2072_v47 }
 0x9fd   : > { %3543 = vpow2.f32 %v2038_v60  ;;  %v3008_v60 = vld [vmem:[%s3961_s26 + $0xa] ss:$0 sm:$0xff] }
 0x9fe   : > { %3545 = vpow2.f32 %v2040_v62 }
 0x9ff   : > { %3547 = vpow2.f32 %v2042_v1 }
 0xa06   : > { %v3542_v53 = vpop.eup %3541 }
 0xa07   : > { %v3544_v2 = vpop.eup %3543 }
 0xa08   : > { %v2057_v4 = vmul.f32 0.0, %v3544_v2  ;;  %v3546_v5 = vpop.eup %3545 }
 0xa09   : > { %v2058_v10 = vmul.f32 0.0, %v3546_v5  ;;  %v3548_v11 = vpop.eup %3547 }
 0xa0a   : > { %v2059_v14 = vmul.f32 0.0, %v3548_v11 }
 0xa32   : > { %v2120_v50 = vpop.f32.mrb[56].mxu1 }
 0xa33   : > { %v2264_v51 = vadd.f32 %v2120_v50, %v2056_v46  ;;  %v3291_v52 = vpop.f32.mrb[57].mxu1 }
 0xa34   : > { %v2123_v54 = vpop.f32.mrb[58].mxu1 }
 0xa35   : > { %v2272_v55 = vmul.f32 %v3542_v53, %v2264_v51  ;;  %v3292_v56 = vpop.f32.mrb[59].mxu1 }
 0xa37   : > { %v2281_v57 = vpack.c.bf16 %v2272_v55, %v2272_v55 }
 0xa39   : > { %3314 = vmatmul.mubr.msk.bf16.vlgmr.msra.gmra.mrb[64].mxu1 %vm910_vm5, %v2281_v57 }
 0xa3a   : > { %3324 = vmatpush3.bf16.msra.mxu1 %v2381_v58  ;;  %3325 = vmatprep.mubr.msk.bf16.mxu1 %vm3718_vm3, %v3717_v7 }
 0xa3b   : > { %3335 = vmatprep.subr.bf16.mxu1 %v3717_v7 }
 0xa5e   : > { %v2065_v3 = vpop.xlane.xlu1 %2064 }
 0xa5f   : > { %v2073_v8 = vadd.f32 %v2065_v3, %v2057_v4 }
 0xa61   : > { %3549 = vrcp.f32 %v2073_v8 }
 0xa62   : > { %v2068_v6 = vpop.xlane.xlu0 %2067 }
 0xa63   : > { %v2074_v12 = vadd.f32 %v2068_v6, %v2058_v10 }
 0xa65   : > { %3551 = vrcp.f32 %v2074_v12  ;;  %v3495_v12 = vld [vmem:[%s3945_s15] sm:$0xff]  }
 0xa66   : > { %v2071_v13 = vpop.xlane.xlu0 %2070 }
 0xa67   : > { %v2075_v15 = vadd.f32 %v2071_v13, %v2059_v14  ;;  %v3496_v13 = vld [vmem:[%s3945_s15 + $0x8] sm:$0xff]   ;;  %s2727_s15 = sshll.u32 %s3963_s1, 4  ;;  %s4305_s15 = int_to_ptr.vmem [resolvable:$true] %s2727_s15 }
 0xa68   : > { %s3589_s17 = scalar_lea.vmem %s4305_s15, 128 }
 0xa69   : > { %3553 = vrcp.f32 %v2075_v15  ;;  %v3499_v15 = vld [vmem:[%s3951_s24 + $0x10] sm:$0xff]   ;;  %p3590_p4 = scmp.ne.s32.totalorder %s4305_s15, %s3589_s17 }
 0xa6b   : > { %v3550_v19 = vpop.eup %3549  ;;  %p3591_p1 = pnand %p3590_p4, %p4419_p0 }
 0xa6d   : > { %p3592_p3 = pneg %p3591_p1 }
 0xa6f   : > { %v3552_v29 = vpop.eup %3551 }
 0xa73   : > { %v3554_v37 = vpop.eup %3553 }
 0xaa5   : > { %v2166_v16 = vpop.f32.mrb[44].mxu0 }
 0xaa6   : > { %v2265_v17 = vadd.f32 %v2166_v16, %v2057_v4  ;;  %v3297_v18 = vpop.f32.mrb[45].mxu0  ;;  %v3500_v16 = vld [vmem:[%s3951_s24 + $0x18] sm:$0xff]  }
 0xaa7   : > { %v2169_v20 = vpop.f32.mrb[46].mxu0  ;;  %v3502_v18 = vld [vmem:[%s3951_s24 + $0x28] sm:$0xff]  }
 0xaa8   : > { %v2273_v22 = vmul.f32 %v3550_v19, %v2265_v17  ;;  %v3298_v23 = vpop.f32.mrb[47].mxu0  ;;  %v3501_v17 = vld [vmem:[%s3951_s24 + $0x20] sm:$0xff]  }
 0xaa9   : > { %v2212_v24 = vpop.f32.mrb[60].mxu1  ;;  %v3009_v23 = vld [vmem:[%s3961_s26 + $0xe] ss:$0 sm:$0xff] }
 0xaaa   : > { %v2282_v25 = vpack.c.bf16 %v2273_v22, %v2273_v22  ;;  %v2266_v26 = vadd.f32 %v2212_v24, %v2058_v10  ;;  %v3303_v27 = vpop.f32.mrb[61].mxu1 }
 0xaab   : > { %v2215_v30 = vpop.f32.mrb[62].mxu1 }
 0xaac   : > { %v2274_v31 = vmul.f32 %v3552_v29, %v2266_v26  ;;  %v3304_v32 = vpop.f32.mrb[63].mxu1  ;;  %3320 = vmatmul.mubr.msk.bf16.vlgmr.msra.gmra.mrb[52].mxu0 %vm910_vm5, %v2282_v25  ;;  %v3010_v25 = vld [vmem:[%s3961_s26 + $0xf] ss:$0 sm:$0xff]  ;;  %v3503_v29 = vld [vmem:[%s3951_s24 + $0x30] sm:$0xff]   ;;  %v3504_v30 = vld [vmem:[%s3951_s24 + $0x38] sm:$0xff]  }
 0xaad   : > { %v2258_v33 = vpop.f32.mrb[48].mxu0  ;;  %3330 = vmatpush3.bf16.msra.mxu0 %v2427_v28  ;;  %3331 = vmatprep.mubr.msk.bf16.mxu0 %vm3718_vm3, %v3717_v7 }
 0xaae   : > { %v2283_v34 = vpack.c.bf16 %v2274_v31, %v2274_v31  ;;  %v2267_v35 = vadd.f32 %v2258_v33, %v2059_v14  ;;  %v3309_v36 = vpop.f32.mrb[49].mxu0  ;;  %3343 = vmatprep.subr.bf16.mxu0 %v3717_v7  ;;  %v3498_v14 = vld [vmem:[%s3951_s24 + $0x8] sm:$0xff]   ;;  %v3011_v31 = vld [vmem:[%s460_s0] ss:$0 sm:$0xff]  ;;  %s3027_s0 = sshll.u32 %s3699_s12, 7  ;;  %s3722_s12 = smov [#allocation6]  }
 0xaaf   : > { %v2261_v38 = vpop.f32.mrb[50].mxu0  ;;  %s4303_s13 = scalar_lea.hbm %s4416_s14, %s3027_s0 }
 0xab0   : > { %v2275_v39 = vmul.f32 %v3554_v37, %v2267_v35  ;;  %v3310_v40 = vpop.f32.mrb[51].mxu0  ;;  %3326 = vmatmul.mubr.msk.bf16.vlgmr.msra.gmra.mrb[68].mxu1 %vm910_vm5, %v2283_v34 }
 0xab1   : > { %3339 = vmatprep.mubr.msk.bf16.mxu1 %vm3718_vm3, %v3717_v7  ;;  %3336 = vmatpush3.bf16.msra.mxu1 %v3495_v12 }
 0xab2   : > { %v2284_v41 = vpack.c.bf16 %v2275_v39, %v2275_v39  ;;  %3337 = vmatprep.subr.bf16.mxu1 %v3717_v7  ;;  %v3015_v39 = vld [vmem:[%s3961_s26 + $0xb] ss:$0 sm:$0xff] }
 0xab4   : > { %3332 = vmatmul.mubr.msk.bf16.vlgmr.msra.gmra.mrb[56].mxu0 %vm910_vm5, %v2284_v41 }
 0xab5   : > { %3359 = vmatprep.mubr.msk.bf16.mxu0 %vm3718_vm3, %v3717_v7  ;;  %3338 = vmatpush3.bf16.msra.mxu1 %v3496_v13 }
 0xb0c   : > { %v2325_v42 = vpop.f32.mrb[64].mxu1 }
 0xb0d   : > { %v3315_v43 = vpop.f32.mrb[65].mxu1  ;;  %v2469_v47 = vsel %vm502_vm4, %v2325_v42, 0.0 }
 0xb0e   : > { %v2328_v44 = vpop.f32.mrb[66].mxu1 }
 0xb0f   : > { %v3316_v45 = vpop.f32.mrb[67].mxu1 }
 0xb7f   : > { %v2371_v46 = vpop.f32.mrb[52].mxu0 }
 0xb80   : > { %v2470_v48 = vsel %vm502_vm4, %v2371_v46, 0.0  ;;  %v3321_v49 = vpop.f32.mrb[53].mxu0 }
 0xb81   : > { %v2471_v50 = vadd.f32 %v2470_v48, %v2469_v47  ;;  %v2374_v51 = vpop.f32.mrb[54].mxu0 }
 0xb82   : > { %v3322_v52 = vpop.f32.mrb[55].mxu0 }
 0xb83   : > { %v2417_v53 = vpop.f32.mrb[68].mxu1 }
 0xb84   : > { %v2472_v54 = vsel %vm502_vm4, %v2417_v53, 0.0  ;;  %v3327_v9 = vpop.f32.mrb[69].mxu1 }
 0xb85   : > { %v2473_v55 = vadd.f32 %v2472_v54, %v2471_v50  ;;  %v2420_v56 = vpop.f32.mrb[70].mxu1  ;;  %v3024_v9 = vld [vmem:[%s3961_s26 + $0x10] ss:$0 sm:$0xff] }
 0xb86   : > { %v3328_v57 = vpop.f32.mrb[71].mxu1  ;;  %v3025_v56 = vld [vmem:[%s3961_s26 + $0x11] ss:$0 sm:$0xff] }
 0xb87   : > { %v2463_v58 = vpop.f32.mrb[56].mxu0 }
 0xb88   : > { %v2474_v59 = vsel %vm502_vm4, %v2463_v58, 0.0  ;;  %v3333_v61 = vpop.f32.mrb[57].mxu0 }
 0xb89   : > { %v2475_v62 = vadd.f32 %v2474_v59, %v2473_v55  ;;  %v2466_v63 = vpop.f32.mrb[58].mxu0 }
 0xb8a   : > { %v3334_v1 = vpop.f32.mrb[59].mxu0 }
 0xb8b   : > { %v2481_v2 = vadd.f32 %v3008_v60, %v2475_v62 }
 0xb8d   : > { %v2482_v3 = vadd.f32 %v2481_v2, %v4148_v0  ;;  %v3497_v0 = vld [vmem:[%s3951_s24] sm:$0xff]   ;;  %s3593_s24 = sshll.u32 %s3722_s12, 4  ;;  %s3594_s24 = int_to_ptr.vmem [resolvable:$false] %s3593_s24 }
 0xb8e   : > { %3344 = vmatpush3.bf16.msra.mxu0 %v3497_v0  ;;  %s3595_s29 = scalar_lea.vmem %s3594_s24, 256  ;;  %p3596_p6 = scmp.lt.s32.totalorder %s4305_s15, %s3594_s24 }
 0xb8f   : > { %v2483_v4 = vsel %vm502_vm4, %v2482_v3, 0.0  ;;  %3345 = vmatprep.subr.bf16.mxu0 %v3717_v7  ;;  %p3597_p9 = scmp.lt.s32.totalorder %s3595_s29, %s3589_s17 }
 0xb90   : > { %2484 = vadd.xlane.f32.xlu1 %v2483_v4 }
 0xb91   : > { %p3598_p10 = por %p3597_p9, %p3596_p6 }
 0xb92   : > { %3346 = vmatpush3.bf16.msra.mxu0 %v3498_v14 }
 0xb93   : > { %3347 = vmatprep.subr.bf16.mxu0 %v3717_v7  ;;  %p3599_p11 = pnand %p3598_p10, %p3592_p3 }
 0xb96   : > { %3348 = vmatpush3.bf16.msra.mxu0 %v3499_v15 }
 0xb97   : > { %3349 = vmatprep.subr.bf16.mxu0 %v3717_v7 }
 0xb9a   : > { %3350 = vmatpush3.bf16.msra.mxu0 %v3500_v16 }
 0xb9b   : > { %3351 = vmatprep.subr.bf16.mxu0 %v3717_v7 }
 0xb9e   : > { %3352 = vmatpush3.bf16.msra.mxu0 %v3501_v17 }
 0xb9f   : > { %3353 = vmatprep.subr.bf16.mxu0 %v3717_v7 }
 0xba2   : > { %3354 = vmatpush3.bf16.msra.mxu0 %v3502_v18 }
 0xba3   : > { %3355 = vmatprep.subr.bf16.mxu0 %v3717_v7 }
 0xba6   : > { %3356 = vmatpush3.bf16.msra.mxu0 %v3503_v29 }
 0xba7   : > { %3357 = vmatprep.subr.bf16.mxu0 %v3717_v7 }
 0xbaa   : > { %3358 = vmatpush3.bf16.msra.mxu0 %v3504_v30 }
 0xc1d   : > { %v2485_v5 = vpop.xlane.xlu1 %2484 }
 0xc1e   : > { %v2486_v6 = vmul.f32 0.03125, %v2485_v5 }
 0xc20   : > { %v2487_v8 = vsub.f32 %v2482_v3, %v2486_v6 }
 0xc22   : > { %v2488_v10 = vmul.f32 %v2487_v8, %v2487_v8 }
 0xc24   : > { %v2489_v11 = vsel %vm502_vm4, %v2488_v10, 0.0 }
 0xc25   : > { %2490 = vadd.xlane.f32.xlu0 %v2489_v11 }
 0xcb2   : > { %v2491_v19 = vpop.xlane.xlu0 %2490 }
 0xcb3   : > { %v2492_v20 = vmul.f32 0.03125, %v2491_v19 }
 0xcb5   : > { %v2493_v21 = vadd.f32 1e-05, %v2492_v20 }
 0xcb7   : > { %3555 = vrsqrt.f32 %v2493_v21 }
 0xcc1   : > { %v3556_v22 = vpop.eup %3555 }
 0xcc2   : > { %v2495_v24 = vmul.f32 %v3556_v22, %v2487_v8 }
 0xcc4   : > { %v2501_v26 = vmul.f32 %v3009_v23, %v2495_v24 }
 0xcc6   : > { %v2507_v27 = vadd.f32 %v3010_v25, %v2501_v26 }
 0xcc8   : > { %v2508_v28 = vpack.c.bf16 %v2507_v27, %v2507_v27 }
 0xcca   : > { %3340 = vmatmul.mubr.msk.bf16.vlgmr.msra.gmra.mrb[72].mxu1 %vm502_vm4, %v2508_v28 }
 0xd9d   : > { %v2569_v32 = vpop.f32.mrb[72].mxu1 }
 0xd9e   : > { %v2570_v33 = vadd.f32 %v3011_v31, %v2569_v32  ;;  %v3341_v34 = vpop.f32.mrb[73].mxu1 }
 0xd9f   : > { %v2572_v35 = vpop.f32.mrb[74].mxu1 }
 0xda0   : > { %v2575_v36 = vmax.f32 %v2570_v33, 0.0  ;;  %v3342_v37 = vpop.f32.mrb[75].mxu1 }
 0xda2   : > { %v2576_v38 = vpack.c.bf16 %v2575_v36, %v2575_v36 }
 0xda4   : > { %3360 = vmatmul.mubr.bf16.vlgmr.msra.gmra.mrb[60].mxu0 %v2576_v38 }
 0xe77   : > { %v2680_v40 = vpop.f32.mrb[60].mxu0 }
 0xe78   : > { %v2681_v41 = vadd.f32 %v3015_v39, %v2680_v40  ;;  %v3361_v42 = vpop.f32.mrb[61].mxu0 }
 0xe79   : > { %v2683_v7 = vpop.f32.mrb[62].mxu0 }
 0xe7a   : > { %v3362_v43 = vpop.f32.mrb[63].mxu0  ;;  %v2686_v44 = vadd.f32 %v2681_v41, %v2507_v27 }
 0xe7c   : > { %v2687_v45 = vsel %vm502_vm4, %v2686_v44, 0.0 }
 0xe7d   : > { %2688 = vadd.xlane.f32.xlu1 %v2687_v45 }
 0xf0a   : > { %v2689_v46 = vpop.xlane.xlu1 %2688 }
 0xf0b   : > { %v2690_v47 = vmul.f32 0.03125, %v2689_v46 }
 0xf0d   : > { %v2691_v48 = vsub.f32 %v2686_v44, %v2690_v47 }
 0xf0f   : > { %v2692_v49 = vmul.f32 %v2691_v48, %v2691_v48 }
 0xf11   : > { %v2693_v50 = vsel %vm502_vm4, %v2692_v49, 0.0 }
 0xf12   : > { %2694 = vadd.xlane.f32.xlu0 %v2693_v50 }
 0xf9f   : > { %v2695_v51 = vpop.xlane.xlu0 %2694 }
 0xfa0   : > { %v2696_v52 = vmul.f32 0.03125, %v2695_v51 }
 0xfa2   : > { %v2697_v53 = vadd.f32 1e-05, %v2696_v52 }
 0xfa4   : > { %3557 = vrsqrt.f32 %v2697_v53 }
 0xfae   : > { %v3558_v54 = vpop.eup %3557 }
 0xfaf   : > { %v2699_v55 = vmul.f32 %v3558_v54, %v2691_v48 }
 0xfb1   : > { %v2705_v57 = vmul.f32 %v3024_v9, %v2699_v55 }
 0xfb3   : > { %v2711_v58 = vadd.f32 %v3025_v56, %v2705_v57 }
 0xfb5   : > { %2712 = vst.msk [vmem:[%s3963_s1] sm:$0xff] %vm502_vm4, %v2711_v58 }
 0xfb6   : > { %3602 = shalt.err (!%p3599_p11)
}
 0xfb7   : > { %s3603_s1 = scalar_lea.hbm %s4303_s13, 128  ;;  %s3607_s10 = scalar_lea.hbm %s4417_s22, 256 }
 0xfb8   : > { %p3604_p5 = scmp.ne.s32.totalorder %s4303_s13, %s3603_s1  ;;  %p3608_p12 = scmp.lt.u32.totalorder %s4303_s13, %s4417_s22 }
 0xfb9   : > { %p3609_p2 = scmp.lt.u32.totalorder %s3607_s10, %s3603_s1  ;;  %p3611_p4 = scmp.lt.u32.totalorder %s3603_s1, %s4303_s13 }
 0xfba   : > { %p3605_p7 = pnand %p3604_p5, %p4419_p0 }
 0xfbb   : > { %p3610_p8 = por %p3609_p2, %p3608_p12 }
 0xfbc   : > { %p3606_p13 = pneg %p3605_p7 }
 0xfbd   : > { %p3612_p1 = por %p3611_p4, %p3610_p8 }
 0xfbf   : > { %p3613_p3 = pnand %p3612_p1, %p3606_p13 }
 0xfc1   : > { %3616 = shalt.err (!%p3613_p3)
}
 0xfc2   : > { %3369 = dma.vmem_to_hbm [thread:$0]  (%p4419_p0), %s4305_s15, 128, %s4303_s13, %s2714_s25  }
 0xfc3 PF: > { %s4420_s8 = sld [smem:[#allocation15_spill]]  ;;  %s4421_s27 = sld [smem:[#allocation9_spill]] }
 0xfc4   : > { %s4422_s9 = sld [smem:[#allocation20_spill]] }
 0xfc9   : > { %p3380_p6 = scmp.ge.s32.totalorder %s4420_s8, 2  ;;  %s2739_s3 = sand.u32 1, %s4421_s27  }
 0xfca   : > { %p4423_p9 = scmp.ne.s32.totalorder %s4422_s9, 0  ;;  %s2740_s11 = scalar_lea.sflag [#allocation5], %s2739_s3 }
 0xfcc   : > { %p3376_p10 = pnand %p3380_p6, %p4423_p9 }
 0xfce   : > { %3666 = dma.done.wait (!%p3376_p10), %s2740_s11, 128  }
 0xfcf   : > { %3668 = vsyncadd (!%p3376_p10), %s2740_s11, 4294967168  ;;  %s24_s15 = sadd.s32 1, %s4420_s8   ;;  %s4424_s0 = sld [smem:[#allocation10_spill]] }
 0xfd0   : > { %p21_p11 = scmp.ge.s32.totalorder %s24_s15, 6   ;;  %s4425_s29 = sld [smem:[#allocation19_spill]] }
 0xfd1   : > { %s4426_s30 = sld [smem:[#allocation11_spill]]  ;;  %s4427_s9 = sld [smem:[#allocation12_spill]] }
 0xfd2   : > { %s4428_s10 = sld [smem:[#allocation18_spill]]  ;;  %s4429_s11 = sld [smem:[#allocation13_spill]] }
 0xfd3   : > { %s4430_s12 = sld [smem:[#allocation14_spill]]  ;;  %s4431_s13 = sld [smem:[#allocation16_spill]] }
 0xfd4   : > { %s4432_s14 = sld [smem:[#allocation17_spill]]  ;;  %s4433_s27 = smov %s3675_s28 }
 0xfd5   : > { %s4434_s28 = smov %s4424_s0  ;;  %23 = sbr.rel (!%p21_p11) target bundleno = 14 (0xe), region = 132 }
 0xfdc   :  { %2745 = vsyncpa [#allocation4], 1 }
 0xfdd   :  { %2747 = vsyncpa [#allocation4 + $0x1], 1 }
 0xfde   :  { %2748 = vsyncpa [#allocation5], 1 }
 0xfdf   :  { %2750 = vsyncpa [#allocation5 + $0x1], 1 }

</bundles_post_ra>
